<compile_context>
chip_gen: v6e
topology: v6e:2x2x1
jax: 0.10.0
libtpu: 0.0.40
codegen_flags: <defaults>
</compile_context>

<pallas_src>
import jax
import jax.numpy as jnp
from jax.experimental import pallas as pl
from jax.experimental.pallas import tpu as pltpu

N_PAD = 128  # lane-dense padded logits width (valid logits = first 10 columns)


# ------------------------------ fused kernel --------------------------------

def _fused_cnn_kernel(x_ref, b1e_ref, b1o_ref, bias1_ref,
                      b2e_ref, b2o_ref, bias2_ref,
                      wfc_ref, bfc_ref, o_ref, pool1_scr):
    f32 = jnp.float32
    x = x_ref[0]                                             # (28, 28)

    # ---- conv1 (+bias, relu), W-pool fused via even/odd banded matmuls ----
    w1cols = bias1_ref.shape[1]                              # 12 * C1
    acc_e = jnp.zeros((24, w1cols), f32)
    acc_o = jnp.zeros((24, w1cols), f32)
    for kh in range(5):
        xs = x[kh:kh + 24, :]                                # (24, 28)
        acc_e = acc_e + jnp.dot(xs, b1e_ref[kh], preferred_element_type=f32)
        acc_o = acc_o + jnp.dot(xs, b1o_ref[kh], preferred_element_type=f32)
    bias1 = bias1_ref[...]                                   # (1, 12*C1)
    ye = jnp.maximum(acc_e + bias1, 0.0)
    yo = jnp.maximum(acc_o + bias1, 0.0)
    wpool1 = jnp.maximum(ye, yo)                             # (24, 12*C1)

    # H-pool: (24, 12*C1) -> (12, 12*C1), kept in VMEM scratch.
    for i in range(12):
        row = jnp.maximum(wpool1[2 * i:2 * i + 1, :],
                          wpool1[2 * i + 1:2 * i + 2, :])    # (1, 12*C1)
        pool1_scr[pl.ds(i, 1), :] = row
    pool1 = pool1_scr[...]                                   # (12, 12*C1)

    # ---- conv2 (+bias, relu), W-pool fused via even/odd banded matmuls ----
    w2cols = bias2_ref.shape[1]                              # 4 * C2
    acc2_e = jnp.zeros((8, w2cols), f32)
    acc2_o = jnp.zeros((8, w2cols), f32)
    for kh in range(5):
        ps = pool1[kh:kh + 8, :]                             # (8, 12*C1)
        acc2_e = acc2_e + jnp.dot(ps, b2e_ref[kh], preferred_element_type=f32)
        acc2_o = acc2_o + jnp.dot(ps, b2o_ref[kh], preferred_element_type=f32)
    bias2 = bias2_ref[...]                                   # (1, 4*C2)
    y2e = jnp.maximum(acc2_e + bias2, 0.0)
    y2o = jnp.maximum(acc2_o + bias2, 0.0)
    wpool2 = jnp.maximum(y2e, y2o)                           # (8, 4*C2)

    # ---- H-pool fused with flatten + FC (dropout = identity in eval) ------
    logits = bfc_ref[...]                                    # (1, 128), zero-padded
    for h in range(4):
        prow = jnp.maximum(wpool2[2 * h:2 * h + 1, :],
                           wpool2[2 * h + 1:2 * h + 2, :])   # (1, 4*C2)
        logits = logits + jnp.dot(prow, wfc_ref[h], preferred_element_type=f32)
    o_ref[0] = logits.astype(o_ref.dtype)                    # lane-dense (1, 128) store


# --------------------- host-side weight preprocessing -----------------------
# (weight-only transforms; tiny, done once per parameter set)

def _build_conv1_banded(w1):
    """w1: (C1, 1, 5, 5) OIHW -> (B1e, B1o), each (5, 28, 12*C1) banded matrices."""
    c1 = w1.shape[0]
    k, w_in, n_half = 5, 28, 12
    win = jnp.arange(w_in)[:, None]
    j = jnp.arange(n_half)[None, :]
    outs = []
    for p in (0, 1):
        tap = win - (2 * j + p)                              # (28, 12)
        valid = (tap >= 0) & (tap < k)
        tap_c = jnp.clip(tap, 0, k - 1)
        per_kh = []
        for kh in range(k):
            wk_t = w1[:, 0, kh, :].T                         # (5, C1)
            vals = wk_t[tap_c]                               # (28, 12, C1)
            vals = jnp.where(valid[:, :, None], vals, 0.0)
            per_kh.append(vals.reshape(w_in, n_half * c1))
        outs.append(jnp.stack(per_kh, axis=0))               # (5, 28, 12*C1)
    return outs[0], outs[1]


def _build_conv2_banded(w2):
    """w2: (C2, C1, 5, 5) -> (B2e, B2o), each (5, 12*C1, 4*C2) banded matrices."""
    c2, c1 = w2.shape[0], w2.shape[1]
    k, w_in, n_half = 5, 12, 4
    win = jnp.arange(w_in)[:, None]
    j = jnp.arange(n_half)[None, :]
    outs = []
    for p in (0, 1):
        tap = win - (2 * j + p)                              # (12, 4)
        valid = (tap >= 0) & (tap < k)
        tap_c = jnp.clip(tap, 0, k - 1)
        per_kh = []
        for kh in range(k):
            wk_t = jnp.transpose(w2[:, :, kh, :], (2, 1, 0))  # (5, C1, C2)
            vals = wk_t[tap_c]                               # (12, 4, C1, C2)
            vals = jnp.where(valid[:, :, None, None], vals, 0.0)
            vals = jnp.transpose(vals, (0, 2, 1, 3))         # (12, C1, 4, C2)
            per_kh.append(vals.reshape(w_in * c1, n_half * c2))
        outs.append(jnp.stack(per_kh, axis=0))               # (5, 12*C1, 4*C2)
    return outs[0], outs[1]


def _build_fc(w_fc, b_fc, c2, n_pad=N_PAD):
    """w_fc: (C2*16, 10) rows in PyTorch NCHW-flatten order -> (4, 4*C2, 128) in
    the kernel's (h, w, c) order, output columns zero-padded to 128 (lane-dense)."""
    n_cls = w_fc.shape[1]
    w = w_fc.reshape(c2, 4, 4, n_cls)                        # (c, h, w, 10)
    w = jnp.transpose(w, (1, 2, 0, 3))                       # (h, w, c, 10)
    w = w.reshape(4, 4 * c2, n_cls)                          # (h, w*C2+c, 10)
    w = jnp.pad(w, ((0, 0), (0, 0), (0, n_pad - n_cls)))
    b = jnp.pad(b_fc, (0, n_pad - n_cls)).reshape(1, n_pad)
    return w, b


# ------------------------------ forward pass ---------------------------------

def cnn_model_forward(x_nchw, params):
    n, cin, h, w = x_nchw.shape
    assert (cin, h, w) == (1, 28, 28), "module requires 1x28x28 inputs (fc1 = C2*4*4)"
    c1 = params["w1"].shape[0]
    c2 = params["w2"].shape[0]

    x2d = x_nchw[:, 0, :, :]                                 # (N, 28, 28)

    b1e, b1o = _build_conv1_banded(params["w1"])             # (5, 28, 12*C1)
    bias1 = jnp.tile(params["b1"], 12).reshape(1, 12 * c1)
    b2e, b2o = _build_conv2_banded(params["w2"])             # (5, 12*C1, 4*C2)
    bias2 = jnp.tile(params["b2"], 4).reshape(1, 4 * c2)
    wfc, bfc = _build_fc(params["w_fc"], params["b_fc"], c2)  # (4, 4*C2, 128), (1, 128)

    out_pad = pl.pallas_call(
        _fused_cnn_kernel,
        out_shape=jax.ShapeDtypeStruct((n, 1, N_PAD), jnp.float32),
        grid=(n,),
        in_specs=[
            pl.BlockSpec((1, 28, 28), lambda i: (i, 0, 0)),            # x (per image)
            pl.BlockSpec((5, 28, 12 * c1), lambda i: (0, 0, 0)),       # B1 even
            pl.BlockSpec((5, 28, 12 * c1), lambda i: (0, 0, 0)),       # B1 odd
            pl.BlockSpec((1, 12 * c1), lambda i: (0, 0)),              # bias1 (tiled)
            pl.BlockSpec((5, 12 * c1, 4 * c2), lambda i: (0, 0, 0)),   # B2 even
            pl.BlockSpec((5, 12 * c1, 4 * c2), lambda i: (0, 0, 0)),   # B2 odd
            pl.BlockSpec((1, 4 * c2), lambda i: (0, 0)),               # bias2 (tiled)
            pl.BlockSpec((4, 4 * c2, N_PAD), lambda i: (0, 0, 0)),     # fc weight
            pl.BlockSpec((1, N_PAD), lambda i: (0, 0)),                # fc bias (padded)
        ],
        out_specs=pl.BlockSpec((1, 1, N_PAD), lambda i: (i, 0, 0)),
        scratch_shapes=[pltpu.VMEM((12, 12 * c1), jnp.float32)],
        compiler_params=pltpu.CompilerParams(
            dimension_semantics=("parallel",),
            vmem_limit_bytes=32 * 1024 * 1024,
        ),
    )(x2d, b1e, b1o, bias1, b2e, b2o, bias2, wfc, bfc)

    return out_pad[:, 0, :10]                                # (N, 10) logits


# ------------------------- pure-JAX reference (check) ------------------------

def reference_forward(x_nchw, params):
    x = jnp.transpose(x_nchw, (0, 2, 3, 1))                  # NHWC

    def conv_relu(xx, w, b):
        y = jax.lax.conv_general_dilated(
            xx, jnp.transpose(w, (2, 3, 1, 0)), window_strides=(1, 1),
            padding="VALID", dimension_numbers=("NHWC", "HWIO", "NHWC"))
        return jnp.maximum(y + b, 0.0)

    def pool(xx):
        return jnp.maximum(
            jnp.maximum(xx[:, 0::2, 0::2, :], xx[:, 0::2, 1::2, :]),
            jnp.maximum(xx[:, 1::2, 0::2, :], xx[:, 1::2, 1::2, :]))

    out = pool(conv_relu(x, params["w1"], params["b1"]))
    out = pool(conv_relu(out, params["w2"], params["b2"]))
    n = out.shape[0]
    flat = jnp.transpose(out, (0, 3, 1, 2)).reshape(n, -1)   # PyTorch NCHW flatten
    return flat @ params["w_fc"] + params["b_fc"]


# ------------------------------ param init -----------------------------------

def init_params(key, channels_one, channels_two):
    k1, k2, k3, k4, k5, k6 = jax.random.split(key, 6)
    w1 = 0.1 * jax.random.normal(k1, (channels_one, 1, 5, 5), jnp.float32)
    b1 = 0.1 * jax.random.normal(k2, (channels_one,), jnp.float32)
    w2 = 0.1 * jax.random.normal(k3, (channels_two, channels_one, 5, 5), jnp.float32)
    b2 = 0.1 * jax.random.normal(k4, (channels_two,), jnp.float32)
    w_fc = 0.1 * jax.random.normal(k5, (channels_two * 4 * 4, 10), jnp.float32)
    b_fc = 0.1 * jax.random.normal(k6, (10,), jnp.float32)
    return dict(w1=w1, b1=b1, w2=w2, b2=b2, w_fc=w_fc, b_fc=b_fc)


# --------------------------------- main ---------------------------------------

if __name__ == "__main__":
    channels_one, channels_two = 8, 16
    batch = 2

    key = jax.random.PRNGKey(0)
    kx, kp = jax.random.split(key)
    x = jax.random.normal(kx, (batch, 1, 28, 28), jnp.float32)   # NCHW, like PyTorch
    params = init_params(kp, channels_one, channels_two)

    fwd = jax.jit(cnn_model_forward)
    logits = fwd(x, params)
    jax.block_until_ready(logits)
    assert logits.shape == (batch, 10), logits.shape

    ref = jax.jit(reference_forward)(x, params)
    jax.block_until_ready(ref)
    err = float(jnp.max(jnp.abs(logits - ref)))
    assert err < 5e-2, f"kernel/reference mismatch: max abs diff {err}"

    print("KERNEL_OK")
</pallas_src>

<mosaic_0001>
module attributes {stable_mosaic.version = 11 : i64} {
  func.func @_fused_cnn_kernel(%arg0: i32, %arg1: memref<1x28x28xf32, #tpu.memory_space<vmem>>, %arg2: memref<5x28x96xf32, #tpu.memory_space<vmem>>, %arg3: memref<5x28x96xf32, #tpu.memory_space<vmem>>, %arg4: memref<1x96xf32, #tpu.memory_space<vmem>>, %arg5: memref<5x96x64xf32, #tpu.memory_space<vmem>>, %arg6: memref<5x96x64xf32, #tpu.memory_space<vmem>>, %arg7: memref<1x64xf32, #tpu.memory_space<vmem>>, %arg8: memref<4x64x128xf32, #tpu.memory_space<vmem>>, %arg9: memref<1x128xf32, #tpu.memory_space<vmem>>, %arg10: memref<1x1x128xf32, #tpu.memory_space<vmem>>, %arg11: memref<12x96xf32, #tpu.memory_space<vmem>>) attributes {dimension_semantics = [#tpu.dimension_semantics<parallel>], iteration_bounds = array<i64: 2>, scalar_prefetch = 0 : i64, scratch_operands = 1 : i64, tpu.core_type = #tpu.core_type<tc>, window_params = [{transform_indices = @transform_0, window_bounds = array<i64: 1, 28, 28>}, {pipeline_mode = #tpu.pipeline_mode<synchronous>, transform_indices = @transform_1, window_bounds = array<i64: 5, 28, 96>}, {pipeline_mode = #tpu.pipeline_mode<synchronous>, transform_indices = @transform_2, window_bounds = array<i64: 5, 28, 96>}, {pipeline_mode = #tpu.pipeline_mode<synchronous>, transform_indices = @transform_3, window_bounds = array<i64: 1, 96>}, {pipeline_mode = #tpu.pipeline_mode<synchronous>, transform_indices = @transform_4, window_bounds = array<i64: 5, 96, 64>}, {pipeline_mode = #tpu.pipeline_mode<synchronous>, transform_indices = @transform_5, window_bounds = array<i64: 5, 96, 64>}, {pipeline_mode = #tpu.pipeline_mode<synchronous>, transform_indices = @transform_6, window_bounds = array<i64: 1, 64>}, {pipeline_mode = #tpu.pipeline_mode<synchronous>, transform_indices = @transform_7, window_bounds = array<i64: 4, 64, 128>}, {pipeline_mode = #tpu.pipeline_mode<synchronous>, transform_indices = @transform_8, window_bounds = array<i64: 1, 128>}, {transform_indices = @transform_9, window_bounds = array<i64: 1, 1, 128>}]} {
    %c0 = arith.constant 0 : index
    %c0_0 = arith.constant 0 : index
    %c0_1 = arith.constant 0 : index
    %0 = vector.load %arg1[%c0, %c0_0, %c0_1] : memref<1x28x28xf32, #tpu.memory_space<vmem>>, vector<1x28x28xf32>
    %1 = vector.shape_cast %0 : vector<1x28x28xf32> to vector<28x28xf32>
    %cst = arith.constant 0.000000e+00 : f32
    %2 = vector.broadcast %cst : f32 to vector<24x96xf32>
    %cst_2 = arith.constant 0.000000e+00 : f32
    %3 = vector.broadcast %cst_2 : f32 to vector<24x96xf32>
    %4 = vector.extract_strided_slice %1 {offsets = [0, 0], sizes = [24, 28], strides = [1, 1]} : vector<28x28xf32> to vector<24x28xf32>
    %c0_3 = arith.constant 0 : index
    %c0_4 = arith.constant 0 : index
    %c0_5 = arith.constant 0 : index
    %5 = vector.load %arg2[%c0_3, %c0_4, %c0_5] : memref<5x28x96xf32, #tpu.memory_space<vmem>>, vector<1x28x96xf32>
    %6 = vector.shape_cast %5 : vector<1x28x96xf32> to vector<28x96xf32>
    %cst_6 = arith.constant dense<0.000000e+00> : vector<24x96xf32>
    %7 = tpu.matmul %4, %6, %cst_6 {dimension_numbers = #tpu.dot_dimension_numbers<[1], [0], [0], [1], [0, 0, 1, 1], [], []>} : vector<24x28xf32>, vector<28x96xf32>, vector<24x96xf32> -> vector<24x96xf32>
    %8 = arith.addf %2, %7 : vector<24x96xf32>
    %c0_7 = arith.constant 0 : index
    %c0_8 = arith.constant 0 : index
    %c0_9 = arith.constant 0 : index
    %9 = vector.load %arg3[%c0_7, %c0_8, %c0_9] : memref<5x28x96xf32, #tpu.memory_space<vmem>>, vector<1x28x96xf32>
    %10 = vector.shape_cast %9 : vector<1x28x96xf32> to vector<28x96xf32>
    %cst_10 = arith.constant dense<0.000000e+00> : vector<24x96xf32>
    %11 = tpu.matmul %4, %10, %cst_10 {dimension_numbers = #tpu.dot_dimension_numbers<[1], [0], [0], [1], [0, 0, 1, 1], [], []>} : vector<24x28xf32>, vector<28x96xf32>, vector<24x96xf32> -> vector<24x96xf32>
    %12 = arith.addf %3, %11 : vector<24x96xf32>
    %13 = vector.extract_strided_slice %1 {offsets = [1, 0], sizes = [24, 28], strides = [1, 1]} : vector<28x28xf32> to vector<24x28xf32>
    %c1 = arith.constant 1 : index
    %c0_11 = arith.constant 0 : index
    %c0_12 = arith.constant 0 : index
    %14 = vector.load %arg2[%c1, %c0_11, %c0_12] : memref<5x28x96xf32, #tpu.memory_space<vmem>>, vector<1x28x96xf32>
    %15 = vector.shape_cast %14 : vector<1x28x96xf32> to vector<28x96xf32>
    %cst_13 = arith.constant dense<0.000000e+00> : vector<24x96xf32>
    %16 = tpu.matmul %13, %15, %cst_13 {dimension_numbers = #tpu.dot_dimension_numbers<[1], [0], [0], [1], [0, 0, 1, 1], [], []>} : vector<24x28xf32>, vector<28x96xf32>, vector<24x96xf32> -> vector<24x96xf32>
    %17 = arith.addf %8, %16 : vector<24x96xf32>
    %c1_14 = arith.constant 1 : index
    %c0_15 = arith.constant 0 : index
    %c0_16 = arith.constant 0 : index
    %18 = vector.load %arg3[%c1_14, %c0_15, %c0_16] : memref<5x28x96xf32, #tpu.memory_space<vmem>>, vector<1x28x96xf32>
    %19 = vector.shape_cast %18 : vector<1x28x96xf32> to vector<28x96xf32>
    %cst_17 = arith.constant dense<0.000000e+00> : vector<24x96xf32>
    %20 = tpu.matmul %13, %19, %cst_17 {dimension_numbers = #tpu.dot_dimension_numbers<[1], [0], [0], [1], [0, 0, 1, 1], [], []>} : vector<24x28xf32>, vector<28x96xf32>, vector<24x96xf32> -> vector<24x96xf32>
    %21 = arith.addf %12, %20 : vector<24x96xf32>
    %22 = vector.extract_strided_slice %1 {offsets = [2, 0], sizes = [24, 28], strides = [1, 1]} : vector<28x28xf32> to vector<24x28xf32>
    %c2 = arith.constant 2 : index
    %c0_18 = arith.constant 0 : index
    %c0_19 = arith.constant 0 : index
    %23 = vector.load %arg2[%c2, %c0_18, %c0_19] : memref<5x28x96xf32, #tpu.memory_space<vmem>>, vector<1x28x96xf32>
    %24 = vector.shape_cast %23 : vector<1x28x96xf32> to vector<28x96xf32>
    %cst_20 = arith.constant dense<0.000000e+00> : vector<24x96xf32>
    %25 = tpu.matmul %22, %24, %cst_20 {dimension_numbers = #tpu.dot_dimension_numbers<[1], [0], [0], [1], [0, 0, 1, 1], [], []>} : vector<24x28xf32>, vector<28x96xf32>, vector<24x96xf32> -> vector<24x96xf32>
    %26 = arith.addf %17, %25 : vector<24x96xf32>
    %c2_21 = arith.constant 2 : index
    %c0_22 = arith.constant 0 : index
    %c0_23 = arith.constant 0 : index
    %27 = vector.load %arg3[%c2_21, %c0_22, %c0_23] : memref<5x28x96xf32, #tpu.memory_space<vmem>>, vector<1x28x96xf32>
    %28 = vector.shape_cast %27 : vector<1x28x96xf32> to vector<28x96xf32>
    %cst_24 = arith.constant dense<0.000000e+00> : vector<24x96xf32>
    %29 = tpu.matmul %22, %28, %cst_24 {dimension_numbers = #tpu.dot_dimension_numbers<[1], [0], [0], [1], [0, 0, 1, 1], [], []>} : vector<24x28xf32>, vector<28x96xf32>, vector<24x96xf32> -> vector<24x96xf32>
    %30 = arith.addf %21, %29 : vector<24x96xf32>
    %31 = vector.extract_strided_slice %1 {offsets = [3, 0], sizes = [24, 28], strides = [1, 1]} : vector<28x28xf32> to vector<24x28xf32>
    %c3 = arith.constant 3 : index
    %c0_25 = arith.constant 0 : index
    %c0_26 = arith.constant 0 : index
    %32 = vector.load %arg2[%c3, %c0_25, %c0_26] : memref<5x28x96xf32, #tpu.memory_space<vmem>>, vector<1x28x96xf32>
    %33 = vector.shape_cast %32 : vector<1x28x96xf32> to vector<28x96xf32>
    %cst_27 = arith.constant dense<0.000000e+00> : vector<24x96xf32>
    %34 = tpu.matmul %31, %33, %cst_27 {dimension_numbers = #tpu.dot_dimension_numbers<[1], [0], [0], [1], [0, 0, 1, 1], [], []>} : vector<24x28xf32>, vector<28x96xf32>, vector<24x96xf32> -> vector<24x96xf32>
    %35 = arith.addf %26, %34 : vector<24x96xf32>
    %c3_28 = arith.constant 3 : index
    %c0_29 = arith.constant 0 : index
    %c0_30 = arith.constant 0 : index
    %36 = vector.load %arg3[%c3_28, %c0_29, %c0_30] : memref<5x28x96xf32, #tpu.memory_space<vmem>>, vector<1x28x96xf32>
    %37 = vector.shape_cast %36 : vector<1x28x96xf32> to vector<28x96xf32>
    %cst_31 = arith.constant dense<0.000000e+00> : vector<24x96xf32>
    %38 = tpu.matmul %31, %37, %cst_31 {dimension_numbers = #tpu.dot_dimension_numbers<[1], [0], [0], [1], [0, 0, 1, 1], [], []>} : vector<24x28xf32>, vector<28x96xf32>, vector<24x96xf32> -> vector<24x96xf32>
    %39 = arith.addf %30, %38 : vector<24x96xf32>
    %40 = vector.extract_strided_slice %1 {offsets = [4, 0], sizes = [24, 28], strides = [1, 1]} : vector<28x28xf32> to vector<24x28xf32>
    %c4 = arith.constant 4 : index
    %c0_32 = arith.constant 0 : index
    %c0_33 = arith.constant 0 : index
    %41 = vector.load %arg2[%c4, %c0_32, %c0_33] : memref<5x28x96xf32, #tpu.memory_space<vmem>>, vector<1x28x96xf32>
    %42 = vector.shape_cast %41 : vector<1x28x96xf32> to vector<28x96xf32>
    %cst_34 = arith.constant dense<0.000000e+00> : vector<24x96xf32>
    %43 = tpu.matmul %40, %42, %cst_34 {dimension_numbers = #tpu.dot_dimension_numbers<[1], [0], [0], [1], [0, 0, 1, 1], [], []>} : vector<24x28xf32>, vector<28x96xf32>, vector<24x96xf32> -> vector<24x96xf32>
    %44 = arith.addf %35, %43 : vector<24x96xf32>
    %c4_35 = arith.constant 4 : index
    %c0_36 = arith.constant 0 : index
    %c0_37 = arith.constant 0 : index
    %45 = vector.load %arg3[%c4_35, %c0_36, %c0_37] : memref<5x28x96xf32, #tpu.memory_space<vmem>>, vector<1x28x96xf32>
    %46 = vector.shape_cast %45 : vector<1x28x96xf32> to vector<28x96xf32>
    %cst_38 = arith.constant dense<0.000000e+00> : vector<24x96xf32>
    %47 = tpu.matmul %40, %46, %cst_38 {dimension_numbers = #tpu.dot_dimension_numbers<[1], [0], [0], [1], [0, 0, 1, 1], [], []>} : vector<24x28xf32>, vector<28x96xf32>, vector<24x96xf32> -> vector<24x96xf32>
    %48 = arith.addf %39, %47 : vector<24x96xf32>
    %c0_39 = arith.constant 0 : index
    %c0_40 = arith.constant 0 : index
    %49 = vector.load %arg4[%c0_39, %c0_40] : memref<1x96xf32, #tpu.memory_space<vmem>>, vector<1x96xf32>
    %50 = vector.broadcast %49 : vector<1x96xf32> to vector<24x96xf32>
    %51 = arith.addf %44, %50 : vector<24x96xf32>
    %cst_41 = arith.constant 0.000000e+00 : f32
    %52 = vector.broadcast %cst_41 : f32 to vector<24x96xf32>
    %53 = arith.maximumf %51, %52 : vector<24x96xf32>
    %54 = vector.broadcast %49 : vector<1x96xf32> to vector<24x96xf32>
    %55 = arith.addf %48, %54 : vector<24x96xf32>
    %cst_42 = arith.constant 0.000000e+00 : f32
    %56 = vector.broadcast %cst_42 : f32 to vector<24x96xf32>
    %57 = arith.maximumf %55, %56 : vector<24x96xf32>
    %58 = arith.maximumf %53, %57 : vector<24x96xf32>
    %59 = vector.extract_strided_slice %58 {offsets = [0, 0], sizes = [1, 96], strides = [1, 1]} : vector<24x96xf32> to vector<1x96xf32>
    %60 = vector.extract_strided_slice %58 {offsets = [1, 0], sizes = [1, 96], strides = [1, 1]} : vector<24x96xf32> to vector<1x96xf32>
    %61 = arith.maximumf %59, %60 : vector<1x96xf32>
    %c0_43 = arith.constant 0 : index
    %c0_44 = arith.constant 0 : index
    %62 = vector.load %arg11[%c0_43, %c0_44] : memref<12x96xf32, #tpu.memory_space<vmem>>, vector<1x96xf32>
    tpu.vector_store %arg11[%c0_43, %c0_44], %61 {strides = array<i32>} : memref<12x96xf32, #tpu.memory_space<vmem>>, vector<1x96xf32>,
    %63 = vector.extract_strided_slice %58 {offsets = [2, 0], sizes = [1, 96], strides = [1, 1]} : vector<24x96xf32> to vector<1x96xf32>
    %64 = vector.extract_strided_slice %58 {offsets = [3, 0], sizes = [1, 96], strides = [1, 1]} : vector<24x96xf32> to vector<1x96xf32>
    %65 = arith.maximumf %63, %64 : vector<1x96xf32>
    %c1_45 = arith.constant 1 : index
    %c0_46 = arith.constant 0 : index
    %66 = vector.load %arg11[%c1_45, %c0_46] : memref<12x96xf32, #tpu.memory_space<vmem>>, vector<1x96xf32>
    tpu.vector_store %arg11[%c1_45, %c0_46], %65 {strides = array<i32>} : memref<12x96xf32, #tpu.memory_space<vmem>>, vector<1x96xf32>,
    %67 = vector.extract_strided_slice %58 {offsets = [4, 0], sizes = [1, 96], strides = [1, 1]} : vector<24x96xf32> to vector<1x96xf32>
    %68 = vector.extract_strided_slice %58 {offsets = [5, 0], sizes = [1, 96], strides = [1, 1]} : vector<24x96xf32> to vector<1x96xf32>
    %69 = arith.maximumf %67, %68 : vector<1x96xf32>
    %c2_47 = arith.constant 2 : index
    %c0_48 = arith.constant 0 : index
    %70 = vector.load %arg11[%c2_47, %c0_48] : memref<12x96xf32, #tpu.memory_space<vmem>>, vector<1x96xf32>
    tpu.vector_store %arg11[%c2_47, %c0_48], %69 {strides = array<i32>} : memref<12x96xf32, #tpu.memory_space<vmem>>, vector<1x96xf32>,
    %71 = vector.extract_strided_slice %58 {offsets = [6, 0], sizes = [1, 96], strides = [1, 1]} : vector<24x96xf32> to vector<1x96xf32>
    %72 = vector.extract_strided_slice %58 {offsets = [7, 0], sizes = [1, 96], strides = [1, 1]} : vector<24x96xf32> to vector<1x96xf32>
    %73 = arith.maximumf %71, %72 : vector<1x96xf32>
    %c3_49 = arith.constant 3 : index
    %c0_50 = arith.constant 0 : index
    %74 = vector.load %arg11[%c3_49, %c0_50] : memref<12x96xf32, #tpu.memory_space<vmem>>, vector<1x96xf32>
    tpu.vector_store %arg11[%c3_49, %c0_50], %73 {strides = array<i32>} : memref<12x96xf32, #tpu.memory_space<vmem>>, vector<1x96xf32>,
    %75 = vector.extract_strided_slice %58 {offsets = [8, 0], sizes = [1, 96], strides = [1, 1]} : vector<24x96xf32> to vector<1x96xf32>
    %76 = vector.extract_strided_slice %58 {offsets = [9, 0], sizes = [1, 96], strides = [1, 1]} : vector<24x96xf32> to vector<1x96xf32>
    %77 = arith.maximumf %75, %76 : vector<1x96xf32>
    %c4_51 = arith.constant 4 : index
    %c0_52 = arith.constant 0 : index
    %78 = vector.load %arg11[%c4_51, %c0_52] : memref<12x96xf32, #tpu.memory_space<vmem>>, vector<1x96xf32>
    tpu.vector_store %arg11[%c4_51, %c0_52], %77 {strides = array<i32>} : memref<12x96xf32, #tpu.memory_space<vmem>>, vector<1x96xf32>,
    %79 = vector.extract_strided_slice %58 {offsets = [10, 0], sizes = [1, 96], strides = [1, 1]} : vector<24x96xf32> to vector<1x96xf32>
    %80 = vector.extract_strided_slice %58 {offsets = [11, 0], sizes = [1, 96], strides = [1, 1]} : vector<24x96xf32> to vector<1x96xf32>
    %81 = arith.maximumf %79, %80 : vector<1x96xf32>
    %c5 = arith.constant 5 : index
    %c0_53 = arith.constant 0 : index
    %82 = vector.load %arg11[%c5, %c0_53] : memref<12x96xf32, #tpu.memory_space<vmem>>, vector<1x96xf32>
    tpu.vector_store %arg11[%c5, %c0_53], %81 {strides = array<i32>} : memref<12x96xf32, #tpu.memory_space<vmem>>, vector<1x96xf32>,
    %83 = vector.extract_strided_slice %58 {offsets = [12, 0], sizes = [1, 96], strides = [1, 1]} : vector<24x96xf32> to vector<1x96xf32>
    %84 = vector.extract_strided_slice %58 {offsets = [13, 0], sizes = [1, 96], strides = [1, 1]} : vector<24x96xf32> to vector<1x96xf32>
    %85 = arith.maximumf %83, %84 : vector<1x96xf32>
    %c6 = arith.constant 6 : index
    %c0_54 = arith.constant 0 : index
    %86 = vector.load %arg11[%c6, %c0_54] : memref<12x96xf32, #tpu.memory_space<vmem>>, vector<1x96xf32>
    tpu.vector_store %arg11[%c6, %c0_54], %85 {strides = array<i32>} : memref<12x96xf32, #tpu.memory_space<vmem>>, vector<1x96xf32>,
    %87 = vector.extract_strided_slice %58 {offsets = [14, 0], sizes = [1, 96], strides = [1, 1]} : vector<24x96xf32> to vector<1x96xf32>
    %88 = vector.extract_strided_slice %58 {offsets = [15, 0], sizes = [1, 96], strides = [1, 1]} : vector<24x96xf32> to vector<1x96xf32>
    %89 = arith.maximumf %87, %88 : vector<1x96xf32>
    %c7 = arith.constant 7 : index
    %c0_55 = arith.constant 0 : index
    %90 = vector.load %arg11[%c7, %c0_55] : memref<12x96xf32, #tpu.memory_space<vmem>>, vector<1x96xf32>
    tpu.vector_store %arg11[%c7, %c0_55], %89 {strides = array<i32>} : memref<12x96xf32, #tpu.memory_space<vmem>>, vector<1x96xf32>,
    %91 = vector.extract_strided_slice %58 {offsets = [16, 0], sizes = [1, 96], strides = [1, 1]} : vector<24x96xf32> to vector<1x96xf32>
    %92 = vector.extract_strided_slice %58 {offsets = [17, 0], sizes = [1, 96], strides = [1, 1]} : vector<24x96xf32> to vector<1x96xf32>
    %93 = arith.maximumf %91, %92 : vector<1x96xf32>
    %c8 = arith.constant 8 : index
    %c0_56 = arith.constant 0 : index
    %94 = vector.load %arg11[%c8, %c0_56] : memref<12x96xf32, #tpu.memory_space<vmem>>, vector<1x96xf32>
    tpu.vector_store %arg11[%c8, %c0_56], %93 {strides = array<i32>} : memref<12x96xf32, #tpu.memory_space<vmem>>, vector<1x96xf32>,
    %95 = vector.extract_strided_slice %58 {offsets = [18, 0], sizes = [1, 96], strides = [1, 1]} : vector<24x96xf32> to vector<1x96xf32>
    %96 = vector.extract_strided_slice %58 {offsets = [19, 0], sizes = [1, 96], strides = [1, 1]} : vector<24x96xf32> to vector<1x96xf32>
    %97 = arith.maximumf %95, %96 : vector<1x96xf32>
    %c9 = arith.constant 9 : index
    %c0_57 = arith.constant 0 : index
    %98 = vector.load %arg11[%c9, %c0_57] : memref<12x96xf32, #tpu.memory_space<vmem>>, vector<1x96xf32>
    tpu.vector_store %arg11[%c9, %c0_57], %97 {strides = array<i32>} : memref<12x96xf32, #tpu.memory_space<vmem>>, vector<1x96xf32>,
    %99 = vector.extract_strided_slice %58 {offsets = [20, 0], sizes = [1, 96], strides = [1, 1]} : vector<24x96xf32> to vector<1x96xf32>
    %100 = vector.extract_strided_slice %58 {offsets = [21, 0], sizes = [1, 96], strides = [1, 1]} : vector<24x96xf32> to vector<1x96xf32>
    %101 = arith.maximumf %99, %100 : vector<1x96xf32>
    %c10 = arith.constant 10 : index
    %c0_58 = arith.constant 0 : index
    %102 = vector.load %arg11[%c10, %c0_58] : memref<12x96xf32, #tpu.memory_space<vmem>>, vector<1x96xf32>
    tpu.vector_store %arg11[%c10, %c0_58], %101 {strides = array<i32>} : memref<12x96xf32, #tpu.memory_space<vmem>>, vector<1x96xf32>,
    %103 = vector.extract_strided_slice %58 {offsets = [22, 0], sizes = [1, 96], strides = [1, 1]} : vector<24x96xf32> to vector<1x96xf32>
    %104 = vector.extract_strided_slice %58 {offsets = [23, 0], sizes = [1, 96], strides = [1, 1]} : vector<24x96xf32> to vector<1x96xf32>
    %105 = arith.maximumf %103, %104 : vector<1x96xf32>
    %c11 = arith.constant 11 : index
    %c0_59 = arith.constant 0 : index
    %106 = vector.load %arg11[%c11, %c0_59] : memref<12x96xf32, #tpu.memory_space<vmem>>, vector<1x96xf32>
    tpu.vector_store %arg11[%c11, %c0_59], %105 {strides = array<i32>} : memref<12x96xf32, #tpu.memory_space<vmem>>, vector<1x96xf32>,
    %c0_60 = arith.constant 0 : index
    %c0_61 = arith.constant 0 : index
    %107 = vector.load %arg11[%c0_60, %c0_61] : memref<12x96xf32, #tpu.memory_space<vmem>>, vector<12x96xf32>
    %cst_62 = arith.constant 0.000000e+00 : f32
    %108 = vector.broadcast %cst_62 : f32 to vector<8x64xf32>
    %cst_63 = arith.constant 0.000000e+00 : f32
    %109 = vector.broadcast %cst_63 : f32 to vector<8x64xf32>
    %110 = vector.extract_strided_slice %107 {offsets = [0, 0], sizes = [8, 96], strides = [1, 1]} : vector<12x96xf32> to vector<8x96xf32>
    %c0_64 = arith.constant 0 : index
    %c0_65 = arith.constant 0 : index
    %c0_66 = arith.constant 0 : index
    %111 = vector.load %arg5[%c0_64, %c0_65, %c0_66] : memref<5x96x64xf32, #tpu.memory_space<vmem>>, vector<1x96x64xf32>
    %112 = vector.shape_cast %111 : vector<1x96x64xf32> to vector<96x64xf32>
    %cst_67 = arith.constant dense<0.000000e+00> : vector<8x64xf32>
    %113 = tpu.matmul %110, %112, %cst_67 {dimension_numbers = #tpu.dot_dimension_numbers<[1], [0], [0], [1], [0, 0, 1, 1], [], []>} : vector<8x96xf32>, vector<96x64xf32>, vector<8x64xf32> -> vector<8x64xf32>
    %114 = arith.addf %108, %113 : vector<8x64xf32>
    %c0_68 = arith.constant 0 : index
    %c0_69 = arith.constant 0 : index
    %c0_70 = arith.constant 0 : index
    %115 = vector.load %arg6[%c0_68, %c0_69, %c0_70] : memref<5x96x64xf32, #tpu.memory_space<vmem>>, vector<1x96x64xf32>
    %116 = vector.shape_cast %115 : vector<1x96x64xf32> to vector<96x64xf32>
    %cst_71 = arith.constant dense<0.000000e+00> : vector<8x64xf32>
    %117 = tpu.matmul %110, %116, %cst_71 {dimension_numbers = #tpu.dot_dimension_numbers<[1], [0], [0], [1], [0, 0, 1, 1], [], []>} : vector<8x96xf32>, vector<96x64xf32>, vector<8x64xf32> -> vector<8x64xf32>
    %118 = arith.addf %109, %117 : vector<8x64xf32>
    %119 = vector.extract_strided_slice %107 {offsets = [1, 0], sizes = [8, 96], strides = [1, 1]} : vector<12x96xf32> to vector<8x96xf32>
    %c1_72 = arith.constant 1 : index
    %c0_73 = arith.constant 0 : index
    %c0_74 = arith.constant 0 : index
    %120 = vector.load %arg5[%c1_72, %c0_73, %c0_74] : memref<5x96x64xf32, #tpu.memory_space<vmem>>, vector<1x96x64xf32>
    %121 = vector.shape_cast %120 : vector<1x96x64xf32> to vector<96x64xf32>
    %cst_75 = arith.constant dense<0.000000e+00> : vector<8x64xf32>
    %122 = tpu.matmul %119, %121, %cst_75 {dimension_numbers = #tpu.dot_dimension_numbers<[1], [0], [0], [1], [0, 0, 1, 1], [], []>} : vector<8x96xf32>, vector<96x64xf32>, vector<8x64xf32> -> vector<8x64xf32>
    %123 = arith.addf %114, %122 : vector<8x64xf32>
    %c1_76 = arith.constant 1 : index
    %c0_77 = arith.constant 0 : index
    %c0_78 = arith.constant 0 : index
    %124 = vector.load %arg6[%c1_76, %c0_77, %c0_78] : memref<5x96x64xf32, #tpu.memory_space<vmem>>, vector<1x96x64xf32>
    %125 = vector.shape_cast %124 : vector<1x96x64xf32> to vector<96x64xf32>
    %cst_79 = arith.constant dense<0.000000e+00> : vector<8x64xf32>
    %126 = tpu.matmul %119, %125, %cst_79 {dimension_numbers = #tpu.dot_dimension_numbers<[1], [0], [0], [1], [0, 0, 1, 1], [], []>} : vector<8x96xf32>, vector<96x64xf32>, vector<8x64xf32> -> vector<8x64xf32>
    %127 = arith.addf %118, %126 : vector<8x64xf32>
    %128 = vector.extract_strided_slice %107 {offsets = [2, 0], sizes = [8, 96], strides = [1, 1]} : vector<12x96xf32> to vector<8x96xf32>
    %c2_80 = arith.constant 2 : index
    %c0_81 = arith.constant 0 : index
    %c0_82 = arith.constant 0 : index
    %129 = vector.load %arg5[%c2_80, %c0_81, %c0_82] : memref<5x96x64xf32, #tpu.memory_space<vmem>>, vector<1x96x64xf32>
    %130 = vector.shape_cast %129 : vector<1x96x64xf32> to vector<96x64xf32>
    %cst_83 = arith.constant dense<0.000000e+00> : vector<8x64xf32>
    %131 = tpu.matmul %128, %130, %cst_83 {dimension_numbers = #tpu.dot_dimension_numbers<[1], [0], [0], [1], [0, 0, 1, 1], [], []>} : vector<8x96xf32>, vector<96x64xf32>, vector<8x64xf32> -> vector<8x64xf32>
    %132 = arith.addf %123, %131 : vector<8x64xf32>
    %c2_84 = arith.constant 2 : index
    %c0_85 = arith.constant 0 : index
    %c0_86 = arith.constant 0 : index
    %133 = vector.load %arg6[%c2_84, %c0_85, %c0_86] : memref<5x96x64xf32, #tpu.memory_space<vmem>>, vector<1x96x64xf32>
    %134 = vector.shape_cast %133 : vector<1x96x64xf32> to vector<96x64xf32>
    %cst_87 = arith.constant dense<0.000000e+00> : vector<8x64xf32>
    %135 = tpu.matmul %128, %134, %cst_87 {dimension_numbers = #tpu.dot_dimension_numbers<[1], [0], [0], [1], [0, 0, 1, 1], [], []>} : vector<8x96xf32>, vector<96x64xf32>, vector<8x64xf32> -> vector<8x64xf32>
    %136 = arith.addf %127, %135 : vector<8x64xf32>
    %137 = vector.extract_strided_slice %107 {offsets = [3, 0], sizes = [8, 96], strides = [1, 1]} : vector<12x96xf32> to vector<8x96xf32>
    %c3_88 = arith.constant 3 : index
    %c0_89 = arith.constant 0 : index
    %c0_90 = arith.constant 0 : index
    %138 = vector.load %arg5[%c3_88, %c0_89, %c0_90] : memref<5x96x64xf32, #tpu.memory_space<vmem>>, vector<1x96x64xf32>
    %139 = vector.shape_cast %138 : vector<1x96x64xf32> to vector<96x64xf32>
    %cst_91 = arith.constant dense<0.000000e+00> : vector<8x64xf32>
    %140 = tpu.matmul %137, %139, %cst_91 {dimension_numbers = #tpu.dot_dimension_numbers<[1], [0], [0], [1], [0, 0, 1, 1], [], []>} : vector<8x96xf32>, vector<96x64xf32>, vector<8x64xf32> -> vector<8x64xf32>
    %141 = arith.addf %132, %140 : vector<8x64xf32>
    %c3_92 = arith.constant 3 : index
    %c0_93 = arith.constant 0 : index
    %c0_94 = arith.constant 0 : index
    %142 = vector.load %arg6[%c3_92, %c0_93, %c0_94] : memref<5x96x64xf32, #tpu.memory_space<vmem>>, vector<1x96x64xf32>
    %143 = vector.shape_cast %142 : vector<1x96x64xf32> to vector<96x64xf32>
    %cst_95 = arith.constant dense<0.000000e+00> : vector<8x64xf32>
    %144 = tpu.matmul %137, %143, %cst_95 {dimension_numbers = #tpu.dot_dimension_numbers<[1], [0], [0], [1], [0, 0, 1, 1], [], []>} : vector<8x96xf32>, vector<96x64xf32>, vector<8x64xf32> -> vector<8x64xf32>
    %145 = arith.addf %136, %144 : vector<8x64xf32>
    %146 = vector.extract_strided_slice %107 {offsets = [4, 0], sizes = [8, 96], strides = [1, 1]} : vector<12x96xf32> to vector<8x96xf32>
    %c4_96 = arith.constant 4 : index
    %c0_97 = arith.constant 0 : index
    %c0_98 = arith.constant 0 : index
    %147 = vector.load %arg5[%c4_96, %c0_97, %c0_98] : memref<5x96x64xf32, #tpu.memory_space<vmem>>, vector<1x96x64xf32>
    %148 = vector.shape_cast %147 : vector<1x96x64xf32> to vector<96x64xf32>
    %cst_99 = arith.constant dense<0.000000e+00> : vector<8x64xf32>
    %149 = tpu.matmul %146, %148, %cst_99 {dimension_numbers = #tpu.dot_dimension_numbers<[1], [0], [0], [1], [0, 0, 1, 1], [], []>} : vector<8x96xf32>, vector<96x64xf32>, vector<8x64xf32> -> vector<8x64xf32>
    %150 = arith.addf %141, %149 : vector<8x64xf32>
    %c4_100 = arith.constant 4 : index
    %c0_101 = arith.constant 0 : index
    %c0_102 = arith.constant 0 : index
    %151 = vector.load %arg6[%c4_100, %c0_101, %c0_102] : memref<5x96x64xf32, #tpu.memory_space<vmem>>, vector<1x96x64xf32>
    %152 = vector.shape_cast %151 : vector<1x96x64xf32> to vector<96x64xf32>
    %cst_103 = arith.constant dense<0.000000e+00> : vector<8x64xf32>
    %153 = tpu.matmul %146, %152, %cst_103 {dimension_numbers = #tpu.dot_dimension_numbers<[1], [0], [0], [1], [0, 0, 1, 1], [], []>} : vector<8x96xf32>, vector<96x64xf32>, vector<8x64xf32> -> vector<8x64xf32>
    %154 = arith.addf %145, %153 : vector<8x64xf32>
    %c0_104 = arith.constant 0 : index
    %c0_105 = arith.constant 0 : index
    %155 = vector.load %arg7[%c0_104, %c0_105] : memref<1x64xf32, #tpu.memory_space<vmem>>, vector<1x64xf32>
    %156 = vector.broadcast %155 : vector<1x64xf32> to vector<8x64xf32>
    %157 = arith.addf %150, %156 : vector<8x64xf32>
    %cst_106 = arith.constant 0.000000e+00 : f32
    %158 = vector.broadcast %cst_106 : f32 to vector<8x64xf32>
    %159 = arith.maximumf %157, %158 : vector<8x64xf32>
    %160 = vector.broadcast %155 : vector<1x64xf32> to vector<8x64xf32>
    %161 = arith.addf %154, %160 : vector<8x64xf32>
    %cst_107 = arith.constant 0.000000e+00 : f32
    %162 = vector.broadcast %cst_107 : f32 to vector<8x64xf32>
    %163 = arith.maximumf %161, %162 : vector<8x64xf32>
    %164 = arith.maximumf %159, %163 : vector<8x64xf32>
    %c0_108 = arith.constant 0 : index
    %c0_109 = arith.constant 0 : index
    %165 = vector.load %arg9[%c0_108, %c0_109] : memref<1x128xf32, #tpu.memory_space<vmem>>, vector<1x128xf32>
    %166 = vector.extract_strided_slice %164 {offsets = [0, 0], sizes = [1, 64], strides = [1, 1]} : vector<8x64xf32> to vector<1x64xf32>
    %167 = vector.extract_strided_slice %164 {offsets = [1, 0], sizes = [1, 64], strides = [1, 1]} : vector<8x64xf32> to vector<1x64xf32>
    %168 = arith.maximumf %166, %167 : vector<1x64xf32>
    %c0_110 = arith.constant 0 : index
    %c0_111 = arith.constant 0 : index
    %c0_112 = arith.constant 0 : index
    %169 = vector.load %arg8[%c0_110, %c0_111, %c0_112] : memref<4x64x128xf32, #tpu.memory_space<vmem>>, vector<1x64x128xf32>
    %170 = vector.shape_cast %169 : vector<1x64x128xf32> to vector<64x128xf32>
    %cst_113 = arith.constant dense<0.000000e+00> : vector<1x128xf32>
    %171 = tpu.matmul %168, %170, %cst_113 {dimension_numbers = #tpu.dot_dimension_numbers<[1], [0], [0], [1], [0, 0, 1, 1], [], []>} : vector<1x64xf32>, vector<64x128xf32>, vector<1x128xf32> -> vector<1x128xf32>
    %172 = arith.addf %165, %171 : vector<1x128xf32>
    %173 = vector.extract_strided_slice %164 {offsets = [2, 0], sizes = [1, 64], strides = [1, 1]} : vector<8x64xf32> to vector<1x64xf32>
    %174 = vector.extract_strided_slice %164 {offsets = [3, 0], sizes = [1, 64], strides = [1, 1]} : vector<8x64xf32> to vector<1x64xf32>
    %175 = arith.maximumf %173, %174 : vector<1x64xf32>
    %c1_114 = arith.constant 1 : index
    %c0_115 = arith.constant 0 : index
    %c0_116 = arith.constant 0 : index
    %176 = vector.load %arg8[%c1_114, %c0_115, %c0_116] : memref<4x64x128xf32, #tpu.memory_space<vmem>>, vector<1x64x128xf32>
    %177 = vector.shape_cast %176 : vector<1x64x128xf32> to vector<64x128xf32>
    %cst_117 = arith.constant dense<0.000000e+00> : vector<1x128xf32>
    %178 = tpu.matmul %175, %177, %cst_117 {dimension_numbers = #tpu.dot_dimension_numbers<[1], [0], [0], [1], [0, 0, 1, 1], [], []>} : vector<1x64xf32>, vector<64x128xf32>, vector<1x128xf32> -> vector<1x128xf32>
    %179 = arith.addf %172, %178 : vector<1x128xf32>
    %180 = vector.extract_strided_slice %164 {offsets = [4, 0], sizes = [1, 64], strides = [1, 1]} : vector<8x64xf32> to vector<1x64xf32>
    %181 = vector.extract_strided_slice %164 {offsets = [5, 0], sizes = [1, 64], strides = [1, 1]} : vector<8x64xf32> to vector<1x64xf32>
    %182 = arith.maximumf %180, %181 : vector<1x64xf32>
    %c2_118 = arith.constant 2 : index
    %c0_119 = arith.constant 0 : index
    %c0_120 = arith.constant 0 : index
    %183 = vector.load %arg8[%c2_118, %c0_119, %c0_120] : memref<4x64x128xf32, #tpu.memory_space<vmem>>, vector<1x64x128xf32>
    %184 = vector.shape_cast %183 : vector<1x64x128xf32> to vector<64x128xf32>
    %cst_121 = arith.constant dense<0.000000e+00> : vector<1x128xf32>
    %185 = tpu.matmul %182, %184, %cst_121 {dimension_numbers = #tpu.dot_dimension_numbers<[1], [0], [0], [1], [0, 0, 1, 1], [], []>} : vector<1x64xf32>, vector<64x128xf32>, vector<1x128xf32> -> vector<1x128xf32>
    %186 = arith.addf %179, %185 : vector<1x128xf32>
    %187 = vector.extract_strided_slice %164 {offsets = [6, 0], sizes = [1, 64], strides = [1, 1]} : vector<8x64xf32> to vector<1x64xf32>
    %188 = vector.extract_strided_slice %164 {offsets = [7, 0], sizes = [1, 64], strides = [1, 1]} : vector<8x64xf32> to vector<1x64xf32>
    %189 = arith.maximumf %187, %188 : vector<1x64xf32>
    %c3_122 = arith.constant 3 : index
    %c0_123 = arith.constant 0 : index
    %c0_124 = arith.constant 0 : index
    %190 = vector.load %arg8[%c3_122, %c0_123, %c0_124] : memref<4x64x128xf32, #tpu.memory_space<vmem>>, vector<1x64x128xf32>
    %191 = vector.shape_cast %190 : vector<1x64x128xf32> to vector<64x128xf32>
    %cst_125 = arith.constant dense<0.000000e+00> : vector<1x128xf32>
    %192 = tpu.matmul %189, %191, %cst_125 {dimension_numbers = #tpu.dot_dimension_numbers<[1], [0], [0], [1], [0, 0, 1, 1], [], []>} : vector<1x64xf32>, vector<64x128xf32>, vector<1x128xf32> -> vector<1x128xf32>
    %193 = arith.addf %186, %192 : vector<1x128xf32>
    %c0_126 = arith.constant 0 : index
    %c0_127 = arith.constant 0 : index
    %c0_128 = arith.constant 0 : index
    %194 = vector.load %arg10[%c0_126, %c0_127, %c0_128] : memref<1x1x128xf32, #tpu.memory_space<vmem>>, vector<1x1x128xf32>
    %195 = vector.shape_cast %194 : vector<1x1x128xf32> to vector<1x128xf32>
    %196 = vector.shape_cast %193 : vector<1x128xf32> to vector<1x1x128xf32>
    tpu.vector_store %arg10[%c0_126, %c0_127, %c0_128], %196 {strides = array<i32>} : memref<1x1x128xf32, #tpu.memory_space<vmem>>, vector<1x1x128xf32>,
    return
  }
  func.func @transform_0(%arg0: i32) -> (i32, i32, i32) {
    %c0_i32 = arith.constant 0 : i32
    %c0_i32_0 = arith.constant 0 : i32
    %c0_i32_1 = arith.constant 0 : i32
    return %arg0, %c0_i32, %c0_i32_0 : i32, i32, i32
  }
  func.func @transform_1(%arg0: i32) -> (i32, i32, i32) {
    %c0_i32 = arith.constant 0 : i32
    %c0_i32_0 = arith.constant 0 : i32
    %c0_i32_1 = arith.constant 0 : i32
    %c0_i32_2 = arith.constant 0 : i32
    return %c0_i32, %c0_i32_0, %c0_i32_1 : i32, i32, i32
  }
  func.func @transform_2(%arg0: i32) -> (i32, i32, i32) {
    %c0_i32 = arith.constant 0 : i32
    %c0_i32_0 = arith.constant 0 : i32
    %c0_i32_1 = arith.constant 0 : i32
    %c0_i32_2 = arith.constant 0 : i32
    return %c0_i32, %c0_i32_0, %c0_i32_1 : i32, i32, i32
  }
  func.func @transform_3(%arg0: i32) -> (i32, i32) {
    %c0_i32 = arith.constant 0 : i32
    %c0_i32_0 = arith.constant 0 : i32
    %c0_i32_1 = arith.constant 0 : i32
    return %c0_i32, %c0_i32_0 : i32, i32
  }
  func.func @transform_4(%arg0: i32) -> (i32, i32, i32) {
    %c0_i32 = arith.constant 0 : i32
    %c0_i32_0 = arith.constant 0 : i32
    %c0_i32_1 = arith.constant 0 : i32
    %c0_i32_2 = arith.constant 0 : i32
    return %c0_i32, %c0_i32_0, %c0_i32_1 : i32, i32, i32
  }
  func.func @transform_5(%arg0: i32) -> (i32, i32, i32) {
    %c0_i32 = arith.constant 0 : i32
    %c0_i32_0 = arith.constant 0 : i32
    %c0_i32_1 = arith.constant 0 : i32
    %c0_i32_2 = arith.constant 0 : i32
    return %c0_i32, %c0_i32_0, %c0_i32_1 : i32, i32, i32
  }
  func.func @transform_6(%arg0: i32) -> (i32, i32) {
    %c0_i32 = arith.constant 0 : i32
    %c0_i32_0 = arith.constant 0 : i32
    %c0_i32_1 = arith.constant 0 : i32
    return %c0_i32, %c0_i32_0 : i32, i32
  }
  func.func @transform_7(%arg0: i32) -> (i32, i32, i32) {
    %c0_i32 = arith.constant 0 : i32
    %c0_i32_0 = arith.constant 0 : i32
    %c0_i32_1 = arith.constant 0 : i32
    %c0_i32_2 = arith.constant 0 : i32
    return %c0_i32, %c0_i32_0, %c0_i32_1 : i32, i32, i32
  }
  func.func @transform_8(%arg0: i32) -> (i32, i32) {
    %c0_i32 = arith.constant 0 : i32
    %c0_i32_0 = arith.constant 0 : i32
    %c0_i32_1 = arith.constant 0 : i32
    return %c0_i32, %c0_i32_0 : i32, i32
  }
  func.func @transform_9(%arg0: i32) -> (i32, i32, i32) {
    %c0_i32 = arith.constant 0 : i32
    %c0_i32_0 = arith.constant 0 : i32
    %c0_i32_1 = arith.constant 0 : i32
    return %arg0, %c0_i32, %c0_i32_0 : i32, i32, i32
  }
}

</mosaic_0001>

<bundles_post_ra>
// kernel: tile.13
= control target key start
LH: loop header
LB: loop body
LE: loop exit
PB: predicated region body
PF: predicated region fallthrough
CT: control target
= control target key end

     0   :  { %s28_s0 = inlined_call_operand.vmem [shape: f32[8], index: 0, kind: input, shape index: {}]   ;;  %s29_s1 = inlined_call_operand.vmem [shape: f32[12,8], index: 1, kind: output, shape index: {}]  }
   0x1   :  { %v4_v0 = vld [vmem:[%s28_s0] ss:$0 sm:$0xff] }
   0x2   :  { %5 = vst [vmem:[%s29_s1] sm:$0xff] %v4_v0  ;;  %8 = vst [vmem:[%s29_s1 + $0x8] sm:$0xff] %v4_v0 }

// kernel: tile.14
= control target key start
LH: loop header
LB: loop body
LE: loop exit
PB: predicated region body
PF: predicated region fallthrough
CT: control target
= control target key end

     0   :  { %s101_s10 = smov 88   ;;  %s102_s11 = smov 72   ;;  %vm3_vm0 = vcmask 64512   ;;  %vm9_vm1 = vcmask 786112   ;;  %vm15_vm2 = vcmask 720512   ;;  %vm21_vm3 = vcmask 654912   ;;  %s161_s0 = inlined_call_operand.vmem [shape: f32[12,8], index: 0, kind: input, shape index: {}]   ;;  %s162_s1 = inlined_call_operand.vmem [shape: f32[1,96], index: 1, kind: output, shape index: {}]  }
   0x1   :  { %v79_v0 = vld [vmem:[%s161_s0 + $0xb] sm:$0x1]   ;;  %v81_v1 = vld [vmem:[%s161_s0 + $0x9] sm:$0x1]   ;;  %v80_v2 = vld [vmem:[%s161_s0 + $0xa] sm:$0x1]  }
   0x2   :  { %7 = vrot.lane.b32.xlu0 %v79_v0, %s101_s10  ;;  %19 = vrot.lane.b32.xlu1 %v81_v1, %s102_s11  ;;  %v82_v3 = vld [vmem:[%s161_s0 + $0x8] sm:$0x1]   ;;  %s103_s16 = smov 80   ;;  %s104_s17 = smov 64   ;;  %v83_v4 = vld [vmem:[%s161_s0 + $0x7] sm:$0x1]  }
   0x3   :  { %v2_v5 = vld [vmem:[%s161_s0] sm:$0x1]   ;;  %v84_v6 = vld [vmem:[%s161_s0 + $0x6] sm:$0x1]   ;;  %s105_s24 = smov 56   ;;  %s106_s25 = smov 48  }
   0x4   :  { %4 = vst.msk [vmem:[#allocation0] sm:$0x1] %vm3_vm0, %v2_v5   ;;  %v85_v7 = vld [vmem:[%s161_s0 + $0x5] sm:$0x1]   ;;  %v86_v8 = vld [vmem:[%s161_s0 + $0x4] sm:$0x1]  }
   0x5   :  { %s107_s30 = smov 40   ;;  %s108_s2 = smov 32   ;;  %v87_v9 = vld [vmem:[%s161_s0 + $0x3] sm:$0x1]   ;;  %v88_v10 = vld [vmem:[%s161_s0 + $0x2] sm:$0x1]  }
   0x6   :  { %13 = vrot.lane.b32.xlu0 %v80_v2, %s103_s16  ;;  %25 = vrot.lane.b32.xlu1 %v82_v3, %s104_s17  ;;  %s109_s7 = smov 24   ;;  %s110_s8 = smov 16   ;;  %v89_v11 = vld [vmem:[%s161_s0 + $0x1] sm:$0x1]   ;;  %vm27_vm4 = vcmask 589312   ;;  %vm33_vm5 = vcmask 523712  }
   0x7   :  { %s111_s0 = smov 8   ;;  %vm39_vm6 = vcmask 458112   ;;  %vm45_vm7 = vcmask 392512   ;;  %vm51_vm8 = vcmask 326912   ;;  %vm57_vm9 = vcmask 261312  }
   0x8   :  { %vm63_vm10 = vcmask 195712   ;;  %vm69_vm11 = vcmask 130112  }
   0xa   :  { %31 = vrot.lane.b32.xlu0 %v83_v4, %s105_s24  ;;  %37 = vrot.lane.b32.xlu1 %v84_v6, %s106_s25 }
   0xe   :  { %43 = vrot.lane.b32.xlu0 %v85_v7, %s107_s30  ;;  %49 = vrot.lane.b32.xlu1 %v86_v8, %s108_s2 }
  0x12   :  { %55 = vrot.lane.b32.xlu0 %v87_v9, %s109_s7  ;;  %61 = vrot.lane.b32.xlu1 %v88_v10, %s110_s8 }
  0x16   :  { %67 = vrot.lane.b32.xlu0 %v89_v11, %s111_s0 }
  0x74   :  { %v8_v12 = vpop.permute.xlu0 %7   ;;  %v20_v13 = vpop.permute.xlu1 %19  }
  0x75   :  { %10 = vst.msk [vmem:[#allocation0] sm:$0x1] %vm9_vm1, %v8_v12  }
  0x78   :  { %v14_v14 = vpop.permute.xlu0 %13   ;;  %v26_v15 = vpop.permute.xlu1 %25  }
  0x79   :  { %16 = vst.msk [vmem:[#allocation0] sm:$0x1] %vm15_vm2, %v14_v14  }
  0x7a   :  { %22 = vst.msk [vmem:[#allocation0] sm:$0x1] %vm21_vm3, %v20_v13  }
  0x7b   :  { %28 = vst.msk [vmem:[#allocation0] sm:$0x1] %vm27_vm4, %v26_v15  }
  0x7c   :  { %v32_v16 = vpop.permute.xlu0 %31   ;;  %v38_v17 = vpop.permute.xlu1 %37  }
  0x7d   :  { %34 = vst.msk [vmem:[#allocation0] sm:$0x1] %vm33_vm5, %v32_v16  }
  0x7e   :  { %40 = vst.msk [vmem:[#allocation0] sm:$0x1] %vm39_vm6, %v38_v17  }
  0x80   :  { %v44_v18 = vpop.permute.xlu0 %43   ;;  %v50_v19 = vpop.permute.xlu1 %49  }
  0x81   :  { %46 = vst.msk [vmem:[#allocation0] sm:$0x1] %vm45_vm7, %v44_v18  }
  0x82   :  { %52 = vst.msk [vmem:[#allocation0] sm:$0x1] %vm51_vm8, %v50_v19  }
  0x84   :  { %v56_v20 = vpop.permute.xlu0 %55   ;;  %v62_v21 = vpop.permute.xlu1 %61  }
  0x85   :  { %58 = vst.msk [vmem:[#allocation0] sm:$0x1] %vm57_vm9, %v56_v20  }
  0x86   :  { %64 = vst.msk [vmem:[#allocation0] sm:$0x1] %vm63_vm10, %v62_v21  }
  0x88   :  { %v68_v22 = vpop.permute.xlu0 %67  }
  0x89   :  { %70 = vst.msk [vmem:[#allocation0] sm:$0x1] %vm69_vm11, %v68_v22  }
  0x90   :  { %v75_v23 = vld [vmem:[#allocation0] sm:$0x1] }
  0x91   :  { %78 = vst [vmem:[%s162_s1] sm:$0x1] %v75_v23 }

// kernel: tile.18
= control target key start
LH: loop header
LB: loop body
LE: loop exit
PB: predicated region body
PF: predicated region fallthrough
CT: control target
= control target key end

     0   :  { %s22_s0 = inlined_call_operand.vmem [shape: f32[16], index: 0, kind: input, shape index: {}]   ;;  %s23_s1 = inlined_call_operand.vmem [shape: f32[4,16], index: 1, kind: output, shape index: {}]  }
   0x1   :  { %v4_v0 = vld [vmem:[%s22_s0] ss:$0 sm:$0xff] }
   0x2   :  { %5 = vst [vmem:[%s23_s1] sm:$0xf] %v4_v0 }

// kernel: tile.19
= control target key start
LH: loop header
LB: loop body
LE: loop exit
PB: predicated region body
PF: predicated region fallthrough
CT: control target
= control target key end

     0   :  { %vm8_vm0 = vcmask 130048   ;;  %s40_s8 = smov 16   ;;  %s41_s9 = smov 32   ;;  %vm14_vm1 = vcmask 523648   ;;  %vm20_vm2 = vcmask 392448   ;;  %vm26_vm3 = vcmask 261248   ;;  %s58_s0 = inlined_call_operand.vmem [shape: f32[4,16], index: 0, kind: input, shape index: {}]   ;;  %s59_s1 = inlined_call_operand.vmem [shape: f32[1,64], index: 1, kind: output, shape index: {}]  }
   0x1   :  { %v5_v0 = vld [vmem:[%s58_s0] sm:$0xf]  ;;  %s39_s0 = smov 48  }
   0x2   :  { %6 = vst [vmem:[#allocation1] sm:$0xf] %v5_v0 }
   0x9   :  { %v11_v1 = vld [vmem:[#allocation1 + $0x3] sm:$0x1]   ;;  %v23_v2 = vld [vmem:[#allocation1 + $0x1] sm:$0x1]   ;;  %v7_v3 = vld [vmem:[#allocation1] sm:$0x1]  }
   0xa   :  { %12 = vrot.lane.b32.xlu0 %v11_v1, %s39_s0  ;;  %24 = vrot.lane.b32.xlu1 %v23_v2, %s40_s8  ;;  %v17_v4 = vld [vmem:[#allocation1 + $0x2] sm:$0x1]   ;;  %9 = vst.msk [vmem:[#allocation0] sm:$0x1] %vm8_vm0, %v7_v3  }
   0xe   :  { %18 = vrot.lane.b32.xlu0 %v17_v4, %s41_s9 }
  0x7c   :  { %v13_v5 = vpop.permute.xlu0 %12   ;;  %v25_v6 = vpop.permute.xlu1 %24  }
  0x7d   :  { %15 = vst.msk [vmem:[#allocation0] sm:$0x1] %vm14_vm1, %v13_v5  }
  0x80   :  { %v19_v7 = vpop.permute.xlu0 %18  }
  0x81   :  { %21 = vst.msk [vmem:[#allocation0] sm:$0x1] %vm20_vm2, %v19_v7  }
  0x82   :  { %27 = vst.msk [vmem:[#allocation0] sm:$0x1] %vm26_vm3, %v25_v6  }
  0x89   :  { %v32_v8 = vld [vmem:[#allocation0] sm:$0x1] }
  0x8a   :  { %35 = vst [vmem:[%s59_s1] sm:$0x1] %v32_v8 }

// kernel: cnn_model_forward.1
= control target key start
LH: loop header
LB: loop body
LE: loop exit
PB: predicated region body
PF: predicated region fallthrough
CT: control target
= control target key end

     0   :  { %14 = vsyncpa [#allocation4], 0  ;;  %s4848_s0 = inlined_call_operand.vmem [shape: f32[2,28,28], index: 0, kind: input, shape index: {}]   ;;  %s4849_s1 = inlined_call_operand.vmem [shape: f32[5,28,96], index: 1, kind: input, shape index: {}]   ;;  %s4850_s2 = inlined_call_operand.vmem [shape: f32[5,28,96], index: 2, kind: input, shape index: {}]   ;;  %s4851_s3 = inlined_call_operand.vmem [shape: f32[1,96], index: 3, kind: input, shape index: {}]   ;;  %s4852_s4 = inlined_call_operand.vmem [shape: f32[5,96,64], index: 4, kind: input, shape index: {}]   ;;  %s4853_s5 = inlined_call_operand.vmem [shape: f32[5,96,64], index: 5, kind: input, shape index: {}]   ;;  %s4854_s6 = inlined_call_operand.vmem [shape: f32[1,64], index: 6, kind: input, shape index: {}]   ;;  %s4855_s7 = inlined_call_operand.vmem [shape: f32[4,64,128], index: 7, kind: input, shape index: {}]   ;;  %s4856_s8 = inlined_call_operand.vmem [shape: f32[1,128], index: 8, kind: input, shape index: {}]   ;;  %s4857_s9 = inlined_call_operand.hbm [shape: f32[2,1,128], index: 9, kind: output, shape index: {}]  }
   0x1   :  { %16 = vsyncpa [#allocation4 + $0x1], 0  ;;  %s3752_s30 = smov 0   ;;  %s3754_s10 = smov 0  }
   0x2   :  { %s3756_s11 = smov 0   ;;  %s3758_s12 = smov 0  }
   0x3 LB: > { %s3773_s13 = sadd.s32 4294967295, %s3697_s12   ;;  %s2626_s14 = sadd.s32 4294967294, %s3697_s12   ;;  %s3697_s12 = sphi %s3758_s12, %s4863_s12   ;;  %s3693_s11 = sphi %s3756_s11, %s4862_s11   ;;  %s3689_s10 = sphi %s3754_s10, %s4861_s10   ;;  %s3685_s30 = sphi %s3752_s30, %s4860_s30  }
   0x4   : > { %s3777_s15 = sadd.s32 1, %s3697_s12   ;;  %s223_s16 = sadd.s32 1, %s3693_s11 }
   0x5   : > { %s220_s17 = ssub.s32 %s3697_s12, %s3777_s15  ;;  %p233_p0 = scmp.ne.s32.totalorder %s3693_s11, %s3689_s10 }
   0x6   : > { %p221_p1 = scmp.eq.s32.totalorder %s220_s17, 0  ;;  %p234_p2 = scmp.eq.s32.totalorder %s3773_s13, 1 }
   0x7   : > { %p239_p3 = scmp.ne.s32.totalorder %s3689_s10, %s3685_s30  ;;  %p240_p4 = scmp.eq.s32.totalorder %s2626_s14, 1 }
   0x8   : > { %s3788_s18 = scalar_select %p221_p1, %s3693_s11, %s223_s16  }
   0x9   : > { %p3790_p5 = por %p234_p2, %p233_p0  ;;  %p3794_p6 = por %p240_p4, %p239_p3 }
   0xa   : > { %p2629_p7 = scmp.ge.s32.totalorder %s3697_s12, 1  ;;  %p290_p8 = scmp.lt.s32.totalorder %s3697_s12, 3 }
   0xc   : > { %p291_p9 = pnand %p2629_p7, %p290_p8 }
   0xd   : > { %p325_p10 = scmp.lt.s32.totalorder (!%p291_p9), %s3773_s13, 1  ;;  %s323_s17 = sand.u32 (!%p291_p9), 1, %s3689_s10  }
   0xe   : > { %294 = sbr.rel (%p291_p9) target bundleno = 845 (0x34d), region = 56  ;;  %s324_s22 = scalar_lea.vmem (!%p291_p9), [#allocation3], %s323_s17 }
   0xf   : > { %s2571_s23 = sshll.u32 (!%p291_p9), %s324_s22, 4  ;;  %s2559_s27 = scalar_lea.sflag (!%p291_p9), [#allocation4], %s323_s17  ;;  %s2572_s23 = int_to_ptr.vmem [resolvable:$true] %s2571_s23 }
  0x10   : > { %s3637_s28 = scalar_lea.vmem (!%p291_p9), %s2572_s23, 16 }
  0x11   : > { %p3638_p11 = scmp.ne.s32.totalorder (!%p291_p9), %s2572_s23, %s3637_s28 }
  0x13   : > { %v2635_v0 = vld [vmem:[%s4849_s1 + $0x38] sm:$0xf]  ;;  %vm366_vm0 = vcmask 1043456   ;;  %v3699_v2 = vmov 0.0   ;;  %v2634_v3 = vld [vmem:[%s4849_s1 + $0x30] sm:$0xff]  ;;  %v2633_v5 = vld [vmem:[%s4849_s1 + $0x28] sm:$0xff]  ;;  %p3639_p12 = pnand %p3638_p11, %p3790_p5 }
  0x14   : > { %v337_v1 = vld [vmem:[%s4849_s1 + $0x18] sm:$0xf]  ;;  %3080 = vmatprep.subr.mxu0 %v3699_v2  ;;  %3097 = vmatprep.subr.mxu1 %v3699_v2  ;;  %v336_v4 = vld [vmem:[%s4849_s1 + $0x10] sm:$0xff]  ;;  %v335_v6 = vld [vmem:[%s4849_s1 + $0x8] sm:$0xff]  ;;  %s326_s21 = scalar_select %p325_p10, %s3773_s13, 1  ;;  %vm359_vm1 = vcmask 228352  }
  0x15   : > { %3081 = vmatpush3.msk.msra.mxu0 %vm366_vm0, %v2635_v0  ;;  %3098 = vmatpush3.msk.msra.mxu1 %vm366_vm0, %v337_v1  ;;  %v2632_v7 = vld [vmem:[%s4849_s1 + $0x20] sm:$0xff]  ;;  %vm351_vm2 = vcmask 1046528   ;;  %vm3700_vm3 = vmmov 0   ;;  %v2647_v14 = vld [vmem:[%s4850_s2 + $0x38] sm:$0xf]  ;;  %v2646_v19 = vld [vmem:[%s4850_s2 + $0x30] sm:$0xff]  ;;  %p3640_p13 = pneg %p3639_p12 }
  0x16   : > { %3082 = vmatprep.subr.mxu0 %v3699_v2  ;;  %3099 = vmatprep.subr.mxu1 %v3699_v2  ;;  %v334_v8 = vld [vmem:[%s4849_s1] sm:$0xff]  ;;  %s2843_s26 = sshll.u32 %s326_s21, 5  ;;  %v341_v15 = vld [vmem:[%s4850_s2 + $0x18] sm:$0xf]  ;;  %v340_v20 = vld [vmem:[%s4850_s2 + $0x10] sm:$0xff]  ;;  %vm715_vm4 = vcmask 1045504  }
  0x17   : > { %3083 = vmatpush3.msra.mxu0 %v2634_v3  ;;  %3100 = vmatpush3.msra.mxu1 %v336_v4  ;;  %s329_s29 = scalar_lea.vmem %s4848_s0, %s2843_s26  ;;  %v2645_v23 = vld [vmem:[%s4850_s2 + $0x28] sm:$0xff]  ;;  %v2644_v26 = vld [vmem:[%s4850_s2 + $0x20] sm:$0xff]  ;;  %v2659_v28 = vld [vmem:[%s4849_s1 + $0x58] sm:$0xf]  ;;  %vm911_vm5 = vcmask 1044480   ;;  %vm1323_vm6 = vcmask 778240  }
  0x18   : > { %3084 = vmatprep.subr.mxu0 %v3699_v2  ;;  %3101 = vmatprep.subr.mxu1 %v3699_v2  ;;  %v3839_v9 = vld [vmem:[%s329_s29] sm:$0xff]  ;;  %v3841_v10 = vld [vmem:[%s329_s29 + $0x8] sm:$0xff]  ;;  %v3843_v11 = vld [vmem:[%s329_s29 + $0x10] sm:$0xff]  ;;  %vm1325_vm7 = vcmask 780290   ;;  %vm1327_vm8 = vcmask 782340   ;;  %vm1329_vm9 = vcmask 784390  }
  0x19   : > { %3085 = vmatpush3.msra.mxu0 %v2633_v5  ;;  %3102 = vmatpush3.msra.mxu1 %v335_v6  ;;  %v352_v12 = vrot.slane %v3839_v9, 1  ;;  %v353_v13 = vrot.slane %v3841_v10, 1  ;;  %v355_v16 = vrot.slane %v3843_v11, 1  ;;  %v3862_v18 = vld [vmem:[%s329_s29 + $0x18] sm:$0xf]  ;;  %v339_v24 = vld [vmem:[%s4850_s2 + $0x8] sm:$0xff] }
  0x1a   : > { %3086 = vmatprep.subr.mxu0 %v3699_v2  ;;  %3103 = vmatprep.subr.mxu1 %v3699_v2  ;;  %v357_v22 = vrot.slane %v3862_v18, 1  ;;  %v338_v27 = vld [vmem:[%s4850_s2] sm:$0xff]  ;;  %v2667_v29 = vld [vmem:[%s4850_s2 + $0x58] sm:$0xf]  ;;  %v2658_v30 = vld [vmem:[%s4849_s1 + $0x50] sm:$0xff]  ;;  %v716_v34 = vrot.slane %v3839_v9, 2 }
  0x1b   : > { %3087 = vmatpush3.msra.mxu0 %v2632_v7  ;;  %3104 = vmatpush3.msra.mxu1 %v334_v8  ;;  %v354_v17 = vsel %vm351_vm2, %v352_v12, %v353_v13  ;;  %v356_v21 = vsel %vm351_vm2, %v353_v13, %v355_v16  ;;  %v2666_v31 = vld [vmem:[%s4850_s2 + $0x50] sm:$0xff]  ;;  %v2657_v32 = vld [vmem:[%s4849_s1 + $0x48] sm:$0xff]  ;;  %v717_v35 = vrot.slane %v3841_v10, 2  ;;  %v2656_v36 = vld [vmem:[%s4849_s1 + $0x40] sm:$0xff]  ;;  %v719_v39 = vrot.slane %v3843_v11, 2  ;;  %s2840_s21 = sshll.u32 %s3773_s13, 4 }
  0x1c   : > { %3105 = vmatprep.mubr.msk.f32.mxu1 %vm3700_vm3, %v3699_v2  ;;  %3088 = vmatprep.mubr.msk.f32.mxu0 %vm3700_vm3, %v3699_v2  ;;  %v358_v25 = vsel %vm351_vm2, %v355_v16, %v357_v22  ;;  %v2665_v33 = vld [vmem:[%s4850_s2 + $0x48] sm:$0xff]  ;;  %v2664_v37 = vld [vmem:[%s4850_s2 + $0x40] sm:$0xff]  ;;  %v2675_v40 = vld [vmem:[%s4849_s1 + $0x78] sm:$0xf]  ;;  %v721_v45 = vrot.slane %v3862_v18, 2  ;;  %v912_v49 = vrot.slane %v3839_v9, 3  ;;  %s4813_s26 = scalar_lea.hbm %s4857_s9, %s2840_s21 }
  0x1d   : > { %3106 = vmatmul.mubr.msk.f32.vlgmr.msra.gmra.mxu1 %vm359_vm1, %v3839_v9  ;;  %3114 = vmatprep.subr.mxu0 %v3699_v2  ;;  %v718_v38 = vsel %vm715_vm4, %v716_v34, %v717_v35  ;;  %v2683_v41 = vld [vmem:[%s4850_s2 + $0x78] sm:$0xf]  ;;  %v720_v42 = vsel %vm715_vm4, %v717_v35, %v719_v39  ;;  %v2674_v43 = vld [vmem:[%s4849_s1 + $0x70] sm:$0xff]  ;;  %v2673_v46 = vld [vmem:[%s4849_s1 + $0x68] sm:$0xff]  ;;  %v913_v50 = vrot.slane %v3841_v10, 3  ;;  %v915_v54 = vrot.slane %v3843_v11, 3 }
  0x1e   : > { %3131 = vmatprep.subr.mxu1 %v3699_v2  ;;  %3089 = vmatmul.mubr.msk.f32.vlgmr.msra.gmra.mxu0 %vm359_vm1, %v354_v17  ;;  %v2682_v44 = vld [vmem:[%s4850_s2 + $0x70] sm:$0xff]  ;;  %v2681_v47 = vld [vmem:[%s4850_s2 + $0x68] sm:$0xff]  ;;  %v722_v48 = vsel %vm715_vm4, %v719_v39, %v721_v45  ;;  %v2672_v51 = vld [vmem:[%s4849_s1 + $0x60] sm:$0xff]  ;;  %v917_v60 = vrot.slane %v3862_v18, 3  ;;  %v1107_v0 = vrot.slane %v3839_v9, 4  ;;  %v1108_v1 = vrot.slane %v3841_v10, 4 }
  0x1f   : > { %3115 = vmatpush3.msk.msra.mxu0 %vm366_vm0, %v2647_v14  ;;  %3132 = vmatpush3.msk.msra.mxu1 %vm366_vm0, %v341_v15  ;;  %v2680_v52 = vld [vmem:[%s4850_s2 + $0x60] sm:$0xff]  ;;  %v914_v53 = vsel %vm911_vm5, %v912_v49, %v913_v50  ;;  %v2691_v55 = vld [vmem:[%s4849_s1 + $0x98] sm:$0xf]  ;;  %v916_v57 = vsel %vm911_vm5, %v913_v50, %v915_v54  ;;  %v2690_v58 = vld [vmem:[%s4849_s1 + $0x90] sm:$0xff]  ;;  %v1110_v6 = vrot.slane %v3843_v11, 4  ;;  %v1112_v8 = vrot.slane %v3862_v18, 4 }
  0x20   : > { %3108 = vmatprep.mubr.msk.f32.mxu1 %vm3700_vm3, %v3699_v2  ;;  %3116 = vmatprep.subr.mxu0 %v3699_v2  ;;  %v2699_v56 = vld [vmem:[%s4850_s2 + $0x98] sm:$0xf]  ;;  %v2698_v59 = vld [vmem:[%s4850_s2 + $0x90] sm:$0xff]  ;;  %v2689_v61 = vld [vmem:[%s4849_s1 + $0x88] sm:$0xff]  ;;  %v918_v63 = vsel %vm911_vm5, %v915_v54, %v917_v60  ;;  %v1109_v5 = vsel %vm366_vm0, %v1107_v0, %v1108_v1  ;;  %vm1391_vm10 = vcmask 785408   ;;  %vm2233_vm11 = vcmask 523264  }
  0x21   : > { %3133 = vmatprep.subr.mxu1 %v3699_v2  ;;  %3091 = vmatprep.mubr.msk.f32.mxu0 %vm3700_vm3, %v3699_v2  ;;  %v2697_v62 = vld [vmem:[%s4850_s2 + $0x88] sm:$0xff]  ;;  %v2688_v3 = vld [vmem:[%s4849_s1 + $0x80] sm:$0xff]  ;;  %v1111_v7 = vsel %vm366_vm0, %v1108_v1, %v1110_v6  ;;  %v2716_v14 = vld [vmem:[%s4852_s4 + $0xb8] sm:$0xff]  ;;  %s3701_s13 = smov [#allocation3]  }
  0x22   : > { %3109 = vmatmul.mubr.msk.f32.gmra.mxu1 %vm359_vm1, %v3841_v10  ;;  %3117 = vmatpush3.msra.mxu0 %v2646_v19  ;;  %v2696_v4 = vld [vmem:[%s4850_s2 + $0x80] sm:$0xff]  ;;  %v1358_v12 = vld [vmem:[%s4852_s4 + $0x48] sm:$0xff]  ;;  %v1356_v15 = vld [vmem:[%s4852_s4 + $0x38] sm:$0xff]  ;;  %s3641_s29 = sshll.u32 %s3701_s13, 4  ;;  %s3642_s29 = int_to_ptr.vmem [resolvable:$false] %s3641_s29 }
  0x23   : > { %3134 = vmatpush3.msra.mxu1 %v340_v20  ;;  %3092 = vmatmul.mubr.msk.f32.gmra.mxu0 %vm359_vm1, %v356_v21  ;;  %v1357_v13 = vld [vmem:[%s4852_s4 + $0x40] sm:$0xff]  ;;  %v2715_v16 = vld [vmem:[%s4852_s4 + $0xb0] sm:$0xff]  ;;  %v2714_v18 = vld [vmem:[%s4852_s4 + $0xa8] sm:$0xff]  ;;  %s3643_s14 = scalar_lea.vmem %s3642_s29, 32  ;;  %p3644_p0 = scmp.lt.s32.totalorder %s2572_s23, %s3642_s29 }
  0x24   : > { %3118 = vmatprep.subr.mxu0 %v3699_v2  ;;  %3135 = vmatprep.subr.mxu1 %v3699_v2  ;;  %v1354_v19 = vld [vmem:[%s4852_s4 + $0x28] sm:$0xff]  ;;  %v2713_v20 = vld [vmem:[%s4852_s4 + $0xa0] sm:$0xff]  ;;  %v2712_v22 = vld [vmem:[%s4852_s4 + $0x98] sm:$0xff]  ;;  %p3645_p1 = scmp.lt.s32.totalorder %s3643_s14, %s3637_s28 }
  0x25   : > { %3111 = vmatprep.mubr.msk.f32.mxu1 %vm3700_vm3, %v3699_v2  ;;  %3119 = vmatpush3.msra.mxu0 %v2645_v23  ;;  %v1352_v23 = vld [vmem:[%s4852_s4 + $0x18] sm:$0xff] }
  0x26   : > { %3136 = vmatpush3.msra.mxu1 %v339_v24  ;;  %3094 = vmatprep.mubr.msk.f32.mxu0 %vm3700_vm3, %v3699_v2  ;;  %v2711_v24 = vld [vmem:[%s4852_s4 + $0x90] sm:$0xff]  ;;  %p3646_p2 = por %p3645_p1, %p3644_p0 }
  0x27   : > { %3112 = vmatmul.mubr.msk.f32.gmra.mxu1 %vm359_vm1, %v3843_v11  ;;  %3095 = vmatmul.mubr.msk.f32.gmra.mxu0 %vm359_vm1, %v358_v25 }
  0x28   : > { %3120 = vmatprep.subr.mxu0 %v3699_v2  ;;  %3137 = vmatprep.subr.mxu1 %v3699_v2  ;;  %p3647_p3 = pnand %p3646_p2, %p3640_p13 }
  0x29   : > { %3121 = vmatpush3.msra.mxu0 %v2644_v26  ;;  %3138 = vmatpush3.msra.mxu1 %v338_v27  ;;  %v2710_v26 = vld [vmem:[%s4852_s4 + $0x88] sm:$0xff] }
  0x2a   : > { %3139 = vmatprep.mubr.msk.f32.mxu1 %vm3700_vm3, %v3699_v2  ;;  %3122 = vmatprep.mubr.msk.f32.mxu0 %vm3700_vm3, %v3699_v2  ;;  %v1350_v27 = vld [vmem:[%s4852_s4 + $0x8] sm:$0xff] }
  0x2b   : > { %3140 = vmatmul.mubr.msk.f32.vlgmr.msra.gmra.mxu1 %vm359_vm1, %v3839_v9  ;;  %3148 = vmatprep.subr.mxu0 %v3699_v2  ;;  %v1113_v9 = vsel %vm366_vm0, %v1110_v6, %v1112_v8 }
  0x2c   : > { %3165 = vmatprep.subr.mxu1 %v3699_v2  ;;  %3123 = vmatmul.mubr.msk.f32.vlgmr.msra.gmra.mxu0 %vm359_vm1, %v354_v17  ;;  %v1355_v17 = vld [vmem:[%s4852_s4 + $0x30] sm:$0xff] }
  0x2d   : > { %3149 = vmatpush3.msk.msra.mxu0 %vm366_vm0, %v2659_v28  ;;  %3166 = vmatpush3.msk.msra.mxu1 %vm366_vm0, %v2667_v29  ;;  %v2709_v28 = vld [vmem:[%s4852_s4 + $0x80] sm:$0xff] }
  0x2e   : > { %3142 = vmatprep.mubr.msk.f32.mxu1 %vm3700_vm3, %v3699_v2  ;;  %3150 = vmatprep.subr.mxu0 %v3699_v2  ;;  %v1349_v29 = vld [vmem:[%s4852_s4] sm:$0xff] }
  0x2f   : > { %3167 = vmatprep.subr.mxu1 %v3699_v2  ;;  %3125 = vmatprep.mubr.msk.f32.mxu0 %vm3700_vm3, %v3699_v2 }
  0x30   : > { %3143 = vmatmul.mubr.msk.f32.gmra.mxu1 %vm359_vm1, %v3841_v10  ;;  %3151 = vmatpush3.msra.mxu0 %v2658_v30  ;;  %v1360_v10 = vld [vmem:[%s4852_s4 + $0x58] sm:$0xff] }
  0x31   : > { %3168 = vmatpush3.msra.mxu1 %v2666_v31  ;;  %3126 = vmatmul.mubr.msk.f32.gmra.mxu0 %vm359_vm1, %v356_v21  ;;  %v1353_v21 = vld [vmem:[%s4852_s4 + $0x20] sm:$0xff]  ;;  %v2708_v30 = vld [vmem:[%s4852_s4 + $0x78] sm:$0xff]  ;;  %v2707_v31 = vld [vmem:[%s4852_s4 + $0x70] sm:$0xff] }
  0x32   : > { %3152 = vmatprep.subr.mxu0 %v3699_v2  ;;  %3169 = vmatprep.subr.mxu1 %v3699_v2 }
  0x33   : > { %3145 = vmatprep.mubr.msk.f32.mxu1 %vm3700_vm3, %v3699_v2  ;;  %3153 = vmatpush3.msra.mxu0 %v2657_v32  ;;  %v2706_v32 = vld [vmem:[%s4852_s4 + $0x68] sm:$0xff] }
  0x34   : > { %3170 = vmatpush3.msra.mxu1 %v2665_v33  ;;  %3128 = vmatprep.mubr.msk.f32.mxu0 %vm3700_vm3, %v3699_v2  ;;  %v2705_v33 = vld [vmem:[%s4852_s4 + $0x60] sm:$0xff] }
  0x35   : > { %3146 = vmatmul.mubr.msk.f32.gmra.mxu1 %vm359_vm1, %v3843_v11  ;;  %3129 = vmatmul.mubr.msk.f32.gmra.mxu0 %vm359_vm1, %v358_v25  ;;  %v1359_v11 = vld [vmem:[%s4852_s4 + $0x50] sm:$0xff] }
  0x36   : > { %3154 = vmatprep.subr.mxu0 %v3699_v2  ;;  %3171 = vmatprep.subr.mxu1 %v3699_v2  ;;  %v1351_v25 = vld [vmem:[%s4852_s4 + $0x10] sm:$0xff] }
  0x37   : > { %3155 = vmatpush3.msra.mxu0 %v2656_v36  ;;  %3172 = vmatpush3.msra.mxu1 %v2664_v37 }
  0x38   : > { %3173 = vmatprep.mubr.msk.f32.mxu1 %vm3700_vm3, %v3699_v2  ;;  %3156 = vmatprep.mubr.msk.f32.mxu0 %vm3700_vm3, %v3699_v2 }
  0x39   : > { %3174 = vmatmul.mubr.msk.f32.vlgmr.msra.gmra.mxu1 %vm359_vm1, %v718_v38  ;;  %3182 = vmatprep.subr.mxu0 %v3699_v2 }
  0x3a   : > { %3199 = vmatprep.subr.mxu1 %v3699_v2  ;;  %3157 = vmatmul.mubr.msk.f32.vlgmr.msra.gmra.mxu0 %vm359_vm1, %v718_v38 }
  0x3b   : > { %3183 = vmatpush3.msk.msra.mxu0 %vm366_vm0, %v2675_v40  ;;  %3200 = vmatpush3.msk.msra.mxu1 %vm366_vm0, %v2683_v41 }
  0x3c   : > { %3176 = vmatprep.mubr.msk.f32.mxu1 %vm3700_vm3, %v3699_v2  ;;  %3184 = vmatprep.subr.mxu0 %v3699_v2 }
  0x3d   : > { %3201 = vmatprep.subr.mxu1 %v3699_v2  ;;  %3159 = vmatprep.mubr.msk.f32.mxu0 %vm3700_vm3, %v3699_v2 }
  0x3e   : > { %3177 = vmatmul.mubr.msk.f32.gmra.mxu1 %vm359_vm1, %v720_v42  ;;  %3185 = vmatpush3.msra.mxu0 %v2674_v43 }
  0x3f   : > { %3202 = vmatpush3.msra.mxu1 %v2682_v44  ;;  %3160 = vmatmul.mubr.msk.f32.gmra.mxu0 %vm359_vm1, %v720_v42 }
  0x40   : > { %3186 = vmatprep.subr.mxu0 %v3699_v2  ;;  %3203 = vmatprep.subr.mxu1 %v3699_v2 }
  0x41   : > { %3179 = vmatprep.mubr.msk.f32.mxu1 %vm3700_vm3, %v3699_v2  ;;  %3187 = vmatpush3.msra.mxu0 %v2673_v46 }
  0x42   : > { %3204 = vmatpush3.msra.mxu1 %v2681_v47  ;;  %3162 = vmatprep.mubr.msk.f32.mxu0 %vm3700_vm3, %v3699_v2 }
  0x43   : > { %3180 = vmatmul.mubr.msk.f32.gmra.mxu1 %vm359_vm1, %v722_v48  ;;  %3163 = vmatmul.mubr.msk.f32.gmra.mxu0 %vm359_vm1, %v722_v48 }
  0x44   : > { %3188 = vmatprep.subr.mxu0 %v3699_v2  ;;  %3205 = vmatprep.subr.mxu1 %v3699_v2 }
  0x45   : > { %3189 = vmatpush3.msra.mxu0 %v2672_v51  ;;  %3206 = vmatpush3.msra.mxu1 %v2680_v52 }
  0x46   : > { %3207 = vmatprep.mubr.msk.f32.mxu1 %vm3700_vm3, %v3699_v2  ;;  %3190 = vmatprep.mubr.msk.f32.mxu0 %vm3700_vm3, %v3699_v2 }
  0x47   : > { %3208 = vmatmul.mubr.msk.f32.vlgmr.msra.gmra.mxu1 %vm359_vm1, %v914_v53  ;;  %3216 = vmatprep.subr.mxu0 %v3699_v2 }
  0x48   : > { %3233 = vmatprep.subr.mxu1 %v3699_v2  ;;  %3191 = vmatmul.mubr.msk.f32.vlgmr.msra.gmra.mxu0 %vm359_vm1, %v914_v53 }
  0x49   : > { %3217 = vmatpush3.msk.msra.mxu0 %vm366_vm0, %v2691_v55  ;;  %3234 = vmatpush3.msk.msra.mxu1 %vm366_vm0, %v2699_v56 }
  0x4a   : > { %3210 = vmatprep.mubr.msk.f32.mxu1 %vm3700_vm3, %v3699_v2  ;;  %3218 = vmatprep.subr.mxu0 %v3699_v2 }
  0x4b   : > { %3235 = vmatprep.subr.mxu1 %v3699_v2  ;;  %3193 = vmatprep.mubr.msk.f32.mxu0 %vm3700_vm3, %v3699_v2 }
  0x4c   : > { %3211 = vmatmul.mubr.msk.f32.gmra.mxu1 %vm359_vm1, %v916_v57  ;;  %3219 = vmatpush3.msra.mxu0 %v2690_v58 }
  0x4d   : > { %3236 = vmatpush3.msra.mxu1 %v2698_v59  ;;  %3194 = vmatmul.mubr.msk.f32.gmra.mxu0 %vm359_vm1, %v916_v57 }
  0x4e   : > { %3220 = vmatprep.subr.mxu0 %v3699_v2  ;;  %3237 = vmatprep.subr.mxu1 %v3699_v2 }
  0x4f   : > { %3213 = vmatprep.mubr.msk.f32.mxu1 %vm3700_vm3, %v3699_v2  ;;  %3221 = vmatpush3.msra.mxu0 %v2689_v61 }
  0x50   : > { %3238 = vmatpush3.msra.mxu1 %v2697_v62  ;;  %3196 = vmatprep.mubr.msk.f32.mxu0 %vm3700_vm3, %v3699_v2 }
  0x51   : > { %3214 = vmatmul.mubr.msk.f32.gmra.mxu1 %vm359_vm1, %v918_v63  ;;  %3197 = vmatmul.mubr.msk.f32.gmra.mxu0 %vm359_vm1, %v918_v63 }
  0x52   : > { %3222 = vmatprep.subr.mxu0 %v3699_v2  ;;  %3239 = vmatprep.subr.mxu1 %v3699_v2 }
  0x53   : > { %3223 = vmatpush3.msra.mxu0 %v2688_v3  ;;  %3240 = vmatpush3.msra.mxu1 %v2696_v4 }
  0x54   : > { %3241 = vmatprep.mubr.msk.f32.mxu1 %vm3700_vm3, %v3699_v2  ;;  %3224 = vmatprep.mubr.msk.f32.mxu0 %vm3700_vm3, %v3699_v2 }
  0x55   : > { %3242 = vmatmul.mubr.msk.f32.vlgmr.msra.gmra.mxu1 %vm359_vm1, %v1109_v5  ;;  %3225 = vmatmul.mubr.msk.f32.vlgmr.msra.gmra.mxu0 %vm359_vm1, %v1109_v5 }
  0x56   : > { %3244 = vmatprep.mubr.msk.f32.mxu1 %vm3700_vm3, %v3699_v2  ;;  %3227 = vmatprep.mubr.msk.f32.mxu0 %vm3700_vm3, %v3699_v2 }
  0x57   : > { %3277 = vmatprep.subr.mxu1 %v3699_v2  ;;  %3250 = vmatprep.subr.mxu0 %v3699_v2 }
  0x58   : > { %3278 = vmatpush3.msra.mxu1 %v1360_v10  ;;  %3251 = vmatpush3.msra.mxu0 %v2716_v14 }
  0x59   : > { %3245 = vmatmul.mubr.msk.f32.gmra.mxu1 %vm359_vm1, %v1111_v7  ;;  %3228 = vmatmul.mubr.msk.f32.gmra.mxu0 %vm359_vm1, %v1111_v7 }
  0x5a   : > { %3247 = vmatprep.mubr.msk.f32.mxu1 %vm3700_vm3, %v3699_v2  ;;  %3230 = vmatprep.mubr.msk.f32.mxu0 %vm3700_vm3, %v3699_v2 }
  0x5b   : > { %3279 = vmatprep.subr.mxu1 %v3699_v2  ;;  %3252 = vmatprep.subr.mxu0 %v3699_v2 }
  0x5c   : > { %3280 = vmatpush3.msra.mxu1 %v1359_v11  ;;  %3253 = vmatpush3.msra.mxu0 %v2715_v16 }
  0x5d   : > { %3248 = vmatmul.mubr.msk.f32.gmra.mxu1 %vm359_vm1, %v1113_v9  ;;  %3231 = vmatmul.mubr.msk.f32.gmra.mxu0 %vm359_vm1, %v1113_v9 }
  0x5e   : > { %3301 = vmatprep.mubr.msk.f32.mxu1 %vm3700_vm3, %v3699_v2  ;;  %3274 = vmatprep.mubr.msk.f32.mxu0 %vm3700_vm3, %v3699_v2 }
  0x5f   : > { %3281 = vmatprep.subr.mxu1 %v3699_v2  ;;  %3254 = vmatprep.subr.mxu0 %v3699_v2 }
  0x60   : > { %3282 = vmatpush3.msra.mxu1 %v1358_v12  ;;  %3255 = vmatpush3.msra.mxu0 %v2714_v18 }
  0x61   : > { %3283 = vmatprep.subr.mxu1 %v3699_v2  ;;  %3256 = vmatprep.subr.mxu0 %v3699_v2 }
  0x62   : > { %3284 = vmatpush3.msra.mxu1 %v1357_v13  ;;  %3257 = vmatpush3.msra.mxu0 %v2713_v20 }
  0x63   : > { %3285 = vmatprep.subr.mxu1 %v3699_v2  ;;  %3258 = vmatprep.subr.mxu0 %v3699_v2 }
  0x64   : > { %3286 = vmatpush3.msra.mxu1 %v1356_v15  ;;  %3259 = vmatpush3.msra.mxu0 %v2712_v22 }
  0x65   : > { %3287 = vmatprep.subr.mxu1 %v3699_v2  ;;  %3260 = vmatprep.subr.mxu0 %v3699_v2 }
  0x66   : > { %3288 = vmatpush3.msra.mxu1 %v1355_v17  ;;  %3261 = vmatpush3.msra.mxu0 %v2711_v24 }
  0x67   : > { %3289 = vmatprep.subr.mxu1 %v3699_v2  ;;  %3262 = vmatprep.subr.mxu0 %v3699_v2 }
  0x68   : > { %3290 = vmatpush3.msra.mxu1 %v1354_v19  ;;  %3263 = vmatpush3.msra.mxu0 %v2710_v26 }
  0x69   : > { %3291 = vmatprep.subr.mxu1 %v3699_v2  ;;  %3264 = vmatprep.subr.mxu0 %v3699_v2 }
  0x6a   : > { %3292 = vmatpush3.msra.mxu1 %v1353_v21  ;;  %3265 = vmatpush3.msra.mxu0 %v2709_v28  ;;  %v2704_v28 = vld [vmem:[%s4851_s3] ss:$0 sm:$0xff] }
  0x6b   : > { %3293 = vmatprep.subr.mxu1 %v3699_v2  ;;  %3266 = vmatprep.subr.mxu0 %v3699_v2 }
  0x6c   : > { %3294 = vmatpush3.msra.mxu1 %v1352_v23  ;;  %3267 = vmatpush3.msra.mxu0 %v2708_v30 }
  0x6d   : > { %3295 = vmatprep.subr.mxu1 %v3699_v2  ;;  %3268 = vmatprep.subr.mxu0 %v3699_v2 }
  0x6e   : > { %3296 = vmatpush3.msra.mxu1 %v1351_v25  ;;  %3269 = vmatpush3.msra.mxu0 %v2707_v31 }
  0x6f   : > { %3297 = vmatprep.subr.mxu1 %v3699_v2  ;;  %3270 = vmatprep.subr.mxu0 %v3699_v2 }
  0x70   : > { %3298 = vmatpush3.msra.mxu1 %v1350_v27  ;;  %3271 = vmatpush3.msra.mxu0 %v2706_v32 }
  0x71   : > { %3299 = vmatprep.subr.mxu1 %v3699_v2  ;;  %3272 = vmatprep.subr.mxu0 %v3699_v2 }
  0x72   : > { %3300 = vmatpush3.msra.mxu1 %v1349_v29  ;;  %3273 = vmatpush3.msra.mxu0 %v2705_v33 }
  0x73   : > { %3331 = vmatprep.subr.mxu1 %v3699_v2  ;;  %3304 = vmatprep.subr.mxu0 %v3699_v2 }
  0xdd   : > { %v525_v34 = vpop.f32.mrf.mxu1 }
  0xde   : > { %v436_v35 = vpop.f32.mrf.mxu0 }
  0xdf   : > { %v3107_v36 = vpop.f32.mrf.mxu1  ;;  %v526_v15 = vadd.f32 %v525_v34, %v436_v35 }
  0xe0   : > { %v3090_v37 = vpop.f32.mrf.mxu0 }
  0xe2   : > { %v530_v38 = vpop.f32.mrf.mxu1 }
  0xe3   : > { %v441_v39 = vpop.f32.mrf.mxu0 }
  0xe4   : > { %v3110_v40 = vpop.f32.mrf.mxu1  ;;  %v531_v23 = vadd.f32 %v530_v38, %v441_v39 }
  0xe5   : > { %v3093_v41 = vpop.f32.mrf.mxu0 }
  0xe7   : > { %v535_v42 = vpop.f32.mrf.mxu1  ;;  %v446_v43 = vpop.f32.mrf.mxu0 }
  0xe8   : > { %v536_v39 = vadd.f32 %v535_v42, %v446_v43 }
  0xe9   : > { %v3113_v44 = vpop.f32.mrf.mxu1  ;;  %v3096_v45 = vpop.f32.mrf.mxu0 }
  0xeb   : > { %v696_v46 = vpop.f32.mrf.mxu1 }
  0xec   : > { %v613_v47 = vpop.f32.mrf.mxu0 }
  0xed   : > { %v3141_v48 = vpop.f32.mrf.mxu1  ;;  %v697_v16 = vadd.f32 %v696_v46, %v613_v47 }
  0xee   : > { %v3124_v49 = vpop.f32.mrf.mxu0 }
  0xf0   : > { %v701_v50 = vpop.f32.mrf.mxu1 }
  0xf1   : > { %v618_v51 = vpop.f32.mrf.mxu0 }
  0xf2   : > { %v3144_v52 = vpop.f32.mrf.mxu1  ;;  %v702_v24 = vadd.f32 %v701_v50, %v618_v51 }
  0xf3   : > { %v3127_v53 = vpop.f32.mrf.mxu0 }
  0xf5   : > { %v706_v54 = vpop.f32.mrf.mxu1  ;;  %v623_v55 = vpop.f32.mrf.mxu0 }
  0xf6   : > { %v707_v34 = vadd.f32 %v706_v54, %v623_v55 }
  0xf7   : > { %v3147_v56 = vpop.f32.mrf.mxu1  ;;  %v3130_v57 = vpop.f32.mrf.mxu0 }
  0xf9   : > { %v889_v58 = vpop.f32.mrf.mxu1 }
  0xfa   : > { %v798_v59 = vpop.f32.mrf.mxu0  ;;  %v903_v19 = vadd.f32 %v889_v58, %v697_v16  ;;  %v1371_v16 = vld [vmem:[%s4853_s5 + $0x50] sm:$0xff] }
  0xfb   : > { %v3175_v60 = vpop.f32.mrf.mxu1  ;;  %v812_v20 = vadd.f32 %v798_v59, %v526_v15 }
  0xfc   : > { %v3158_v61 = vpop.f32.mrf.mxu0 }
  0xfe   : > { %v894_v62 = vpop.f32.mrf.mxu1 }
  0xff   : > { %v803_v63 = vpop.f32.mrf.mxu0  ;;  %v904_v30 = vadd.f32 %v894_v62, %v702_v24 }
 0x100   : > { %v3178_v0 = vpop.f32.mrf.mxu1  ;;  %v813_v31 = vadd.f32 %v803_v63, %v531_v23 }
 0x101   : > { %v3161_v1 = vpop.f32.mrf.mxu0 }
 0x103   : > { %v899_v3 = vpop.f32.mrf.mxu1  ;;  %v808_v4 = vpop.f32.mrf.mxu0 }
 0x104   : > { %v905_v44 = vadd.f32 %v899_v3, %v707_v34  ;;  %v814_v51 = vadd.f32 %v808_v4, %v536_v39  ;;  %v1366_v34 = vld [vmem:[%s4853_s5 + $0x28] sm:$0xff] }
 0x105   : > { %v3181_v5 = vpop.f32.mrf.mxu1  ;;  %v3164_v6 = vpop.f32.mrf.mxu0  ;;  %v2724_v39 = vld [vmem:[%s4853_s5 + $0x88] sm:$0xff] }
 0x107   : > { %v1085_v7 = vpop.f32.mrf.mxu1 }
 0x108   : > { %v994_v8 = vpop.f32.mrf.mxu0  ;;  %v1099_v25 = vadd.f32 %v1085_v7, %v903_v19 }
 0x109   : > { %v3209_v9 = vpop.f32.mrf.mxu1  ;;  %v1008_v26 = vadd.f32 %v994_v8, %v812_v20 }
 0x10a   : > { %v3192_v10 = vpop.f32.mrf.mxu0 }
 0x10c   : > { %v1090_v11 = vpop.f32.mrf.mxu1 }
 0x10d   : > { %v999_v12 = vpop.f32.mrf.mxu0  ;;  %v1100_v37 = vadd.f32 %v1090_v11, %v904_v30 }
 0x10e   : > { %v3212_v13 = vpop.f32.mrf.mxu1  ;;  %v1009_v40 = vadd.f32 %v999_v12, %v813_v31  ;;  %v2729_v31 = vld [vmem:[%s4853_s5 + $0xb0] sm:$0xff] }
 0x10f   : > { %v3195_v14 = vpop.f32.mrf.mxu0 }
 0x110   : > { %v1372_v14 = vld [vmem:[%s4853_s5 + $0x58] sm:$0xff] }
 0x111   : > { %v1095_v17 = vpop.f32.mrf.mxu1  ;;  %v1004_v18 = vpop.f32.mrf.mxu0 }
 0x112   : > { %v1101_v56 = vadd.f32 %v1095_v17, %v905_v44  ;;  %v1010_v58 = vadd.f32 %v1004_v18, %v814_v51  ;;  %v1370_v17 = vld [vmem:[%s4853_s5 + $0x48] sm:$0xff]  ;;  %v1369_v18 = vld [vmem:[%s4853_s5 + $0x40] sm:$0xff] }
 0x113   : > { %v3215_v21 = vpop.f32.mrf.mxu1  ;;  %v3198_v22 = vpop.f32.mrf.mxu0  ;;  %v1362_v44 = vld [vmem:[%s4853_s5 + $0x8] sm:$0xff] }
 0x114   : > { %v2720_v51 = vld [vmem:[%s4853_s5 + $0x68] sm:$0xff] }
 0x115   : > { %v1280_v27 = vpop.f32.mrf.mxu1  ;;  %v1189_v29 = vpop.f32.mrf.mxu0 }
 0x116   : > { %v1294_v32 = vadd.f32 %v1280_v27, %v1099_v25  ;;  %v1203_v33 = vadd.f32 %v1189_v29, %v1008_v26  ;;  %v2730_v26 = vld [vmem:[%s4853_s5 + $0xb8] sm:$0xff] }
 0x117   : > { %v3243_v35 = vpop.f32.mrf.mxu1  ;;  %v3226_v36 = vpop.f32.mrf.mxu0  ;;  %v1368_v27 = vld [vmem:[%s4853_s5 + $0x38] sm:$0xff] }
 0x118   : > { %v1310_v41 = vadd.f32 %v2704_v28, %v1294_v32  ;;  %v1304_v38 = vadd.f32 %v2704_v28, %v1203_v33  ;;  %v1367_v32 = vld [vmem:[%s4853_s5 + $0x30] sm:$0xff]  ;;  %v2728_v33 = vld [vmem:[%s4853_s5 + $0xa8] sm:$0xff]  ;;  %v2727_v35 = vld [vmem:[%s4853_s5 + $0xa0] sm:$0xff] }
 0x119   : > { %v1285_v45 = vpop.f32.mrf.mxu1  ;;  %v1194_v46 = vpop.f32.mrf.mxu0  ;;  %v1365_v36 = vld [vmem:[%s4853_s5 + $0x20] sm:$0xff] }
 0x11a   : > { %v1313_v47 = vmax.f32 %v1310_v41, 0.0  ;;  %v1307_v48 = vmax.f32 %v1304_v38, 0.0  ;;  %v1295_v49 = vadd.f32 %v1285_v45, %v1100_v37  ;;  %v1204_v50 = vadd.f32 %v1194_v46, %v1009_v40  ;;  %v2726_v37 = vld [vmem:[%s4853_s5 + $0x98] sm:$0xff]  ;;  %v2725_v41 = vld [vmem:[%s4853_s5 + $0x90] sm:$0xff]  ;;  %v2723_v45 = vld [vmem:[%s4853_s5 + $0x80] sm:$0xff] }
 0x11b   : > { %v3246_v52 = vpop.f32.mrf.mxu1  ;;  %v3229_v53 = vpop.f32.mrf.mxu0  ;;  %v1364_v40 = vld [vmem:[%s4853_s5 + $0x18] sm:$0xff]  ;;  %v1363_v38 = vld [vmem:[%s4853_s5 + $0x10] sm:$0xff]  ;;  %v1361_v46 = vld [vmem:[%s4853_s5] sm:$0xff] }
 0x11c   : > { %v1316_v57 = vmax.f32 %v1307_v48, %v1313_v47  ;;  %v1311_v54 = vadd.f32 %v2704_v28, %v1295_v49  ;;  %v1305_v55 = vadd.f32 %v2704_v28, %v1204_v50  ;;  %v2722_v47 = vld [vmem:[%s4853_s5 + $0x78] sm:$0xff]  ;;  %v2721_v49 = vld [vmem:[%s4853_s5 + $0x70] sm:$0xff]  ;;  %v2755_v52 = vld [vmem:[%s4853_s5 + $0x108] sm:$0xff] }
 0x11d   : > { %v1290_v59 = vpop.f32.mrf.mxu1  ;;  %v1199_v60 = vpop.f32.mrf.mxu0  ;;  %v2757_v48 = vld [vmem:[%s4853_s5 + $0x118] sm:$0xff]  ;;  %v2756_v50 = vld [vmem:[%s4853_s5 + $0x110] sm:$0xff]  ;;  %v2719_v53 = vld [vmem:[%s4853_s5 + $0x60] sm:$0xff] }
 0x11e   : > { %v1320_v61 = vrot.slane %v1316_v57, 1  ;;  %v1314_v42 = vmax.f32 %v1311_v54, 0.0  ;;  %v1308_v43 = vmax.f32 %v1305_v55, 0.0  ;;  %v1296_v62 = vadd.f32 %v1290_v59, %v1101_v56  ;;  %v2754_v56 = vld [vmem:[%s4853_s5 + $0x100] sm:$0xff]  ;;  %v2753_v54 = vld [vmem:[%s4853_s5 + $0xf8] sm:$0xff]  ;;  %v2743_v55 = vld [vmem:[%s4852_s4 + $0x110] sm:$0xff] }
 0x11f   : > { %v1205_v63 = vadd.f32 %v1199_v60, %v1010_v58  ;;  %v3249_v0 = vpop.f32.mrf.mxu1  ;;  %v3232_v1 = vpop.f32.mrf.mxu0  ;;  %v2752_v58 = vld [vmem:[%s4853_s5 + $0xf0] sm:$0xff]  ;;  %v2742_v59 = vld [vmem:[%s4852_s4 + $0x108] sm:$0xff] }
 0x120   : > { %v1322_v3 = vmax.f32 %v1316_v57, %v1320_v61  ;;  %v1317_v4 = vmax.f32 %v1308_v43, %v1314_v42  ;;  %v1312_v5 = vadd.f32 %v2704_v28, %v1296_v62  ;;  %v2744_v57 = vld [vmem:[%s4852_s4 + $0x118] sm:$0xff]  ;;  %v2751_v60 = vld [vmem:[%s4853_s5 + $0xe8] sm:$0xff]  ;;  %v2741_v61 = vld [vmem:[%s4852_s4 + $0x100] sm:$0xff] }
 0x121   : > { %v1306_v6 = vadd.f32 %v2704_v28, %v1205_v63  ;;  %v2750_v42 = vld [vmem:[%s4853_s5 + $0xe0] sm:$0xff]  ;;  %v2740_v43 = vld [vmem:[%s4852_s4 + $0xf8] sm:$0xff]  ;;  %v2739_v63 = vld [vmem:[%s4852_s4 + $0xf0] sm:$0xff] }
 0x122   : > { %1324 = vst.msk [vmem:[#allocation2] sm:$0x1] %vm1323_vm6, %v1322_v3  ;;  %v1332_v7 = vrot.slane %v1317_v4, 1  ;;  %v1315_v8 = vmax.f32 %v1312_v5, 0.0  ;;  %v2749_v62 = vld [vmem:[%s4853_s5 + $0xd8] sm:$0xff]  ;;  %v2748_v0 = vld [vmem:[%s4853_s5 + $0xd0] sm:$0xff] }
 0x123   : > { %1326 = vst.msk [vmem:[#allocation2 - $0x1] sm:$0x4] %vm1325_vm7, %v1322_v3  ;;  %v1309_v9 = vmax.f32 %v1306_v6, 0.0  ;;  %v2738_v1 = vld [vmem:[%s4852_s4 + $0xe8] sm:$0xff]  ;;  %v2746_v5 = vld [vmem:[%s4853_s5 + $0xc0] sm:$0xff] }
 0x124   : > { %1328 = vst.msk [vmem:[#allocation2 - $0x2] sm:$0x10] %vm1327_vm8, %v1322_v3  ;;  %v1334_v10 = vmax.f32 %v1317_v4, %v1332_v7  ;;  %v2737_v4 = vld [vmem:[%s4852_s4 + $0xe0] sm:$0xff]  ;;  %v2736_v7 = vld [vmem:[%s4852_s4 + $0xd8] sm:$0xff] }
 0x125   : > { %1330 = vst.msk [vmem:[#allocation2 - $0x3] sm:$0x40] %vm1329_vm9, %v1322_v3  ;;  %v1318_v11 = vmax.f32 %v1309_v9, %v1315_v8  ;;  %v2747_v3 = vld [vmem:[%s4853_s5 + $0xc8] sm:$0xff]  ;;  %v2783_v9 = vld [vmem:[%s4853_s5 + $0x178] sm:$0xff] }
 0x126   : > { %1335 = vst.msk [vmem:[#allocation2 + $0x4] sm:$0x1] %vm1323_vm6, %v1334_v10 }
 0x127   : > { %1336 = vst.msk [vmem:[#allocation2 + $0x3] sm:$0x4] %vm1325_vm7, %v1334_v10  ;;  %v1340_v12 = vrot.slane %v1318_v11, 1 }
 0x128   : > { %1337 = vst.msk [vmem:[#allocation2 + $0x2] sm:$0x10] %vm1327_vm8, %v1334_v10 }
 0x129   : > { %1338 = vst.msk [vmem:[#allocation2 + $0x1] sm:$0x40] %vm1329_vm9, %v1334_v10  ;;  %v1342_v13 = vmax.f32 %v1318_v11, %v1340_v12  ;;  %v2735_v11 = vld [vmem:[%s4852_s4 + $0xd0] sm:$0xff] }
 0x12a   : > { %v2782_v12 = vld [vmem:[%s4853_s5 + $0x170] sm:$0xff] }
 0x12b   : > { %1343 = vst.msk [vmem:[#allocation2 + $0x8] sm:$0x1] %vm1323_vm6, %v1342_v13 }
 0x12c   : > { %1344 = vst.msk [vmem:[#allocation2 + $0x7] sm:$0x4] %vm1325_vm7, %v1342_v13 }
 0x12d   : > { %1345 = vst.msk [vmem:[#allocation2 + $0x6] sm:$0x10] %vm1327_vm8, %v1342_v13 }
 0x12e   : > { %1346 = vst.msk [vmem:[#allocation2 + $0x5] sm:$0x40] %vm1329_vm9, %v1342_v13  ;;  %v2734_v13 = vld [vmem:[%s4852_s4 + $0xc8] sm:$0xff] }
 0x130   : > { %v4227_v15 = vld [vmem:[#allocation2] sm:$0xff] }
 0x131   : > { %3302 = vmatmul.mubr.msk.f32.vlgmr.msra.gmra.mxu1 %vm1391_vm10, %v4227_v15  ;;  %v1388_v20 = vrot.slane %v4227_v15, 1  ;;  %v1875_v21 = vrot.slane %v4227_v15, 3  ;;  %v2048_v24 = vrot.slane %v4227_v15, 4  ;;  %v1702_v8 = vrot.slane %v4227_v15, 2 }
 0x132   : > { %3332 = vmatpush3.msra.mxu1 %v1372_v14  ;;  %3355 = vmatprep.mubr.msk.f32.mxu1 %vm3700_vm3, %v3699_v2  ;;  %v2781_v14 = vld [vmem:[%s4853_s5 + $0x168] sm:$0xff] }
 0x133   : > { %3333 = vmatprep.subr.mxu1 %v3699_v2 }
 0x134   : > { %3334 = vmatpush3.msra.mxu1 %v1371_v16  ;;  %v2780_v16 = vld [vmem:[%s4853_s5 + $0x160] sm:$0xff] }
 0x135   : > { %3335 = vmatprep.subr.mxu1 %v3699_v2  ;;  %v4244_v19 = vld [vmem:[#allocation2 + $0x8] sm:$0xf] }
 0x136   : > { %3336 = vmatpush3.msra.mxu1 %v1370_v17  ;;  %v1389_v22 = vrot.slane %v4244_v19, 1  ;;  %v1876_v23 = vrot.slane %v4244_v19, 3  ;;  %v2049_v25 = vrot.slane %v4244_v19, 4  ;;  %v1703_v6 = vrot.slane %v4244_v19, 2  ;;  %v2770_v17 = vld [vmem:[%s4852_s4 + $0x178] sm:$0xff]  ;;  %v2769_v19 = vld [vmem:[%s4852_s4 + $0x170] sm:$0xff] }
 0x137   : > { %3337 = vmatprep.subr.mxu1 %v3699_v2 }
 0x138   : > { %3338 = vmatpush3.msra.mxu1 %v1369_v18  ;;  %v4260_v28 = vsel %vm351_vm2, %v1388_v20, %v1389_v22  ;;  %v4263_v29 = vsel %vm911_vm5, %v1875_v21, %v1876_v23  ;;  %v4266_v30 = vsel %vm366_vm0, %v2048_v24, %v2049_v25  ;;  %v1704_v10 = vsel %vm715_vm4, %v1702_v8, %v1703_v6  ;;  %v2779_v18 = vld [vmem:[%s4853_s5 + $0x158] sm:$0xff]  ;;  %v2778_v20 = vld [vmem:[%s4853_s5 + $0x150] sm:$0xff]  ;;  %v2768_v21 = vld [vmem:[%s4852_s4 + $0x168] sm:$0xff] }
 0x139   : > { %3275 = vmatmul.mubr.msk.f32.vlgmr.msra.gmra.mxu0 %vm1391_vm10, %v4260_v28  ;;  %3339 = vmatprep.subr.mxu1 %v3699_v2  ;;  %v2777_v22 = vld [vmem:[%s4853_s5 + $0x148] sm:$0xff]  ;;  %v2767_v23 = vld [vmem:[%s4852_s4 + $0x160] sm:$0xff]  ;;  %v2766_v25 = vld [vmem:[%s4852_s4 + $0x158] sm:$0xff] }
 0x13a   : > { %3305 = vmatpush3.msra.mxu0 %v2730_v26  ;;  %3340 = vmatpush3.msra.mxu1 %v1368_v27  ;;  %v2776_v24 = vld [vmem:[%s4853_s5 + $0x140] sm:$0xff]  ;;  %v2775_v26 = vld [vmem:[%s4853_s5 + $0x138] sm:$0xff]  ;;  %v2765_v27 = vld [vmem:[%s4852_s4 + $0x150] sm:$0xff] }
 0x13b   : > { %3306 = vmatprep.subr.mxu0 %v3699_v2  ;;  %3341 = vmatprep.subr.mxu1 %v3699_v2  ;;  %v2817_v6 = vld [vmem:[%s4855_s7 + $0x60] sm:$0xff]  ;;  %v2816_v8 = vld [vmem:[%s4855_s7 + $0x58] sm:$0xff] }
 0x13c   : > { %3307 = vmatpush3.msra.mxu0 %v2729_v31  ;;  %3342 = vmatpush3.msra.mxu1 %v1367_v32  ;;  %v2764_v31 = vld [vmem:[%s4852_s4 + $0x148] sm:$0xff] }
 0x13d   : > { %3308 = vmatprep.subr.mxu0 %v3699_v2  ;;  %3343 = vmatprep.subr.mxu1 %v3699_v2  ;;  %v2773_v32 = vld [vmem:[%s4853_s5 + $0x128] sm:$0xff] }
 0x13e   : > { %3309 = vmatpush3.msra.mxu0 %v2728_v33  ;;  %3344 = vmatpush3.msra.mxu1 %v1366_v34  ;;  %v2763_v33 = vld [vmem:[%s4852_s4 + $0x140] sm:$0xff] }
 0x13f   : > { %3310 = vmatprep.subr.mxu0 %v3699_v2  ;;  %3345 = vmatprep.subr.mxu1 %v3699_v2  ;;  %v2772_v34 = vld [vmem:[%s4853_s5 + $0x120] sm:$0xff] }
 0x140   : > { %3311 = vmatpush3.msra.mxu0 %v2727_v35  ;;  %3346 = vmatpush3.msra.mxu1 %v1365_v36  ;;  %v2762_v35 = vld [vmem:[%s4852_s4 + $0x138] sm:$0xff] }
 0x141   : > { %3312 = vmatprep.subr.mxu0 %v3699_v2  ;;  %3347 = vmatprep.subr.mxu1 %v3699_v2  ;;  %v2809_v36 = vld [vmem:[%s4853_s5 + $0x1d8] sm:$0xff] }
 0x142   : > { %3313 = vmatpush3.msra.mxu0 %v2726_v37  ;;  %3348 = vmatpush3.msra.mxu1 %v1364_v40  ;;  %v2761_v37 = vld [vmem:[%s4852_s4 + $0x130] sm:$0xff] }
 0x143   : > { %3314 = vmatprep.subr.mxu0 %v3699_v2  ;;  %3349 = vmatprep.subr.mxu1 %v3699_v2  ;;  %v2808_v40 = vld [vmem:[%s4853_s5 + $0x1d0] sm:$0xff] }
 0x144   : > { %3315 = vmatpush3.msra.mxu0 %v2725_v41  ;;  %3350 = vmatpush3.msra.mxu1 %v1363_v38  ;;  %v2760_v41 = vld [vmem:[%s4852_s4 + $0x128] sm:$0xff] }
 0x145   : > { %3316 = vmatprep.subr.mxu0 %v3699_v2  ;;  %3351 = vmatprep.subr.mxu1 %v3699_v2  ;;  %v2807_v38 = vld [vmem:[%s4853_s5 + $0x1c8] sm:$0xff] }
 0x146   : > { %3317 = vmatpush3.msra.mxu0 %v2724_v39  ;;  %3352 = vmatpush3.msra.mxu1 %v1362_v44  ;;  %v2759_v39 = vld [vmem:[%s4852_s4 + $0x120] sm:$0xff] }
 0x147   : > { %3318 = vmatprep.subr.mxu0 %v3699_v2  ;;  %3353 = vmatprep.subr.mxu1 %v3699_v2  ;;  %v2806_v44 = vld [vmem:[%s4853_s5 + $0x1c0] sm:$0xff] }
 0x148   : > { %3319 = vmatpush3.msra.mxu0 %v2723_v45  ;;  %3354 = vmatpush3.msra.mxu1 %v1361_v46  ;;  %v2796_v45 = vld [vmem:[%s4852_s4 + $0x1d8] sm:$0xff] }
 0x149   : > { %3320 = vmatprep.subr.mxu0 %v3699_v2  ;;  %3356 = vmatmul.mubr.msk.f32.vlgmr.msra.gmra.mxu1 %vm1391_vm10, %v4227_v15  ;;  %v2733_v15 = vld [vmem:[%s4852_s4 + $0xc0] sm:$0xff]  ;;  %v2805_v46 = vld [vmem:[%s4853_s5 + $0x1b8] sm:$0xff] }
 0x14a   : > { %3321 = vmatpush3.msra.mxu0 %v2722_v47  ;;  %3385 = vmatprep.subr.mxu1 %v3699_v2  ;;  %v2795_v47 = vld [vmem:[%s4852_s4 + $0x1d0] sm:$0xff] }
 0x14b   : > { %3322 = vmatprep.subr.mxu0 %v3699_v2  ;;  %3386 = vmatpush3.msra.mxu1 %v2757_v48  ;;  %v2804_v48 = vld [vmem:[%s4853_s5 + $0x1b0] sm:$0xff] }
 0x14c   : > { %3323 = vmatpush3.msra.mxu0 %v2721_v49  ;;  %3387 = vmatprep.subr.mxu1 %v3699_v2  ;;  %v2803_v49 = vld [vmem:[%s4853_s5 + $0x1a8] sm:$0xff] }
 0x14d   : > { %3324 = vmatprep.subr.mxu0 %v3699_v2  ;;  %3388 = vmatpush3.msra.mxu1 %v2756_v50  ;;  %v2793_v50 = vld [vmem:[%s4852_s4 + $0x1c0] sm:$0xff] }
 0x14e   : > { %3325 = vmatpush3.msra.mxu0 %v2720_v51  ;;  %3389 = vmatprep.subr.mxu1 %v3699_v2  ;;  %v2802_v51 = vld [vmem:[%s4853_s5 + $0x1a0] sm:$0xff] }
 0x14f   : > { %3326 = vmatprep.subr.mxu0 %v3699_v2  ;;  %3390 = vmatpush3.msra.mxu1 %v2755_v52  ;;  %v2792_v52 = vld [vmem:[%s4852_s4 + $0x1b8] sm:$0xff] }
 0x150   : > { %3327 = vmatpush3.msra.mxu0 %v2719_v53  ;;  %3328 = vmatprep.mubr.msk.f32.mxu0 %vm3700_vm3, %v3699_v2  ;;  %v2801_v53 = vld [vmem:[%s4853_s5 + $0x198] sm:$0xff] }
 0x151   : > { %3391 = vmatprep.subr.mxu1 %v3699_v2  ;;  %3329 = vmatmul.mubr.msk.f32.vlgmr.msra.gmra.mxu0 %vm1391_vm10, %v4260_v28  ;;  %v2774_v28 = vld [vmem:[%s4853_s5 + $0x130] sm:$0xff] }
 0x152   : > { %3358 = vmatprep.subr.mxu0 %v3699_v2  ;;  %3392 = vmatpush3.msra.mxu1 %v2754_v56  ;;  %v2791_v56 = vld [vmem:[%s4852_s4 + $0x1b0] sm:$0xff] }
 0x153   : > { %3359 = vmatpush3.msra.mxu0 %v2744_v57  ;;  %3393 = vmatprep.subr.mxu1 %v3699_v2  ;;  %v2800_v57 = vld [vmem:[%s4853_s5 + $0x190] sm:$0xff] }
 0x154   : > { %3360 = vmatprep.subr.mxu0 %v3699_v2  ;;  %3394 = vmatpush3.msra.mxu1 %v2753_v54  ;;  %v2790_v54 = vld [vmem:[%s4852_s4 + $0x1a8] sm:$0xff] }
 0x155   : > { %3361 = vmatpush3.msra.mxu0 %v2743_v55  ;;  %3395 = vmatprep.subr.mxu1 %v3699_v2  ;;  %v2799_v55 = vld [vmem:[%s4853_s5 + $0x188] sm:$0xff] }
 0x156   : > { %3362 = vmatprep.subr.mxu0 %v3699_v2  ;;  %3396 = vmatpush3.msra.mxu1 %v2752_v58  ;;  %v2789_v58 = vld [vmem:[%s4852_s4 + $0x1a0] sm:$0xff] }
 0x157   : > { %3363 = vmatpush3.msra.mxu0 %v2742_v59  ;;  %3397 = vmatprep.subr.mxu1 %v3699_v2  ;;  %v2798_v59 = vld [vmem:[%s4853_s5 + $0x180] sm:$0xff] }
 0x158   : > { %3364 = vmatprep.subr.mxu0 %v3699_v2  ;;  %3398 = vmatpush3.msra.mxu1 %v2751_v60  ;;  %v2788_v60 = vld [vmem:[%s4852_s4 + $0x198] sm:$0xff] }
 0x159   : > { %3365 = vmatpush3.msra.mxu0 %v2741_v61  ;;  %3399 = vmatprep.subr.mxu1 %v3699_v2  ;;  %v2787_v61 = vld [vmem:[%s4852_s4 + $0x190] sm:$0xff] }
 0x15a   : > { %3366 = vmatprep.subr.mxu0 %v3699_v2  ;;  %3400 = vmatpush3.msra.mxu1 %v2750_v42  ;;  %v2786_v42 = vld [vmem:[%s4852_s4 + $0x188] sm:$0xff] }
 0x15b   : > { %3367 = vmatpush3.msra.mxu0 %v2740_v43  ;;  %3401 = vmatprep.subr.mxu1 %v3699_v2  ;;  %v2785_v43 = vld [vmem:[%s4852_s4 + $0x180] sm:$0xff] }
 0x15c   : > { %3368 = vmatprep.subr.mxu0 %v3699_v2  ;;  %3402 = vmatpush3.msra.mxu1 %v2749_v62  ;;  %v2232_v62 = vld [vmem:[%s4855_s7 + $0x38] sm:$0xff] }
 0x15d   : > { %3369 = vmatpush3.msra.mxu0 %v2739_v63  ;;  %3403 = vmatprep.subr.mxu1 %v3699_v2  ;;  %v2231_v63 = vld [vmem:[%s4855_s7 + $0x30] sm:$0xff] }
 0x15e   : > { %3370 = vmatprep.subr.mxu0 %v3699_v2  ;;  %3404 = vmatpush3.msra.mxu1 %v2748_v0  ;;  %v2230_v0 = vld [vmem:[%s4855_s7 + $0x28] sm:$0xff] }
 0x15f   : > { %3371 = vmatpush3.msra.mxu0 %v2738_v1  ;;  %3405 = vmatprep.subr.mxu1 %v3699_v2  ;;  %v2819_v1 = vld [vmem:[%s4855_s7 + $0x70] sm:$0xff] }
 0x160   : > { %3372 = vmatprep.subr.mxu0 %v3699_v2  ;;  %3406 = vmatpush3.msra.mxu1 %v2747_v3  ;;  %v2229_v3 = vld [vmem:[%s4855_s7 + $0x20] sm:$0xff] }
 0x161   : > { %3373 = vmatpush3.msra.mxu0 %v2737_v4  ;;  %3407 = vmatprep.subr.mxu1 %v3699_v2  ;;  %v2818_v4 = vld [vmem:[%s4855_s7 + $0x68] sm:$0xff] }
 0x162   : > { %3374 = vmatprep.subr.mxu0 %v3699_v2  ;;  %3408 = vmatpush3.msra.mxu1 %v2746_v5  ;;  %v2228_v5 = vld [vmem:[%s4855_s7 + $0x18] sm:$0xff] }
 0x163   : > { %3409 = vmatprep.mubr.msk.f32.mxu1 %vm3700_vm3, %v3699_v2  ;;  %3375 = vmatpush3.msra.mxu0 %v2736_v7  ;;  %v2227_v7 = vld [vmem:[%s4855_s7 + $0x10] sm:$0xff] }
 0x164   : > { %3410 = vmatmul.mubr.msk.f32.vlgmr.msra.gmra.mxu1 %vm1391_vm10, %v1704_v10  ;;  %3439 = vmatprep.subr.mxu1 %v3699_v2 }
 0x165   : > { %3376 = vmatprep.subr.mxu0 %v3699_v2  ;;  %3440 = vmatpush3.msra.mxu1 %v2783_v9  ;;  %v2226_v9 = vld [vmem:[%s4855_s7 + $0x8] sm:$0xff] }
 0x166   : > { %3377 = vmatpush3.msra.mxu0 %v2735_v11  ;;  %3441 = vmatprep.subr.mxu1 %v3699_v2  ;;  %v2225_v11 = vld [vmem:[%s4855_s7] sm:$0xff] }
 0x167   : > { %3378 = vmatprep.subr.mxu0 %v3699_v2  ;;  %3442 = vmatpush3.msra.mxu1 %v2782_v12  ;;  %v2814_v12 = vld [vmem:[%s4855_s7 + $0x48] sm:$0xff] }
 0x168   : > { %3379 = vmatpush3.msra.mxu0 %v2734_v13  ;;  %3443 = vmatprep.subr.mxu1 %v3699_v2  ;;  %v2813_v13 = vld [vmem:[%s4855_s7 + $0x40] sm:$0xff] }
 0x169   : > { %3380 = vmatprep.subr.mxu0 %v3699_v2  ;;  %3444 = vmatpush3.msra.mxu1 %v2781_v14 }
 0x16a   : > { %3381 = vmatpush3.msra.mxu0 %v2733_v15  ;;  %3382 = vmatprep.mubr.msk.f32.mxu0 %vm3700_vm3, %v3699_v2 }
 0x16b   : > { %3445 = vmatprep.subr.mxu1 %v3699_v2  ;;  %3383 = vmatmul.mubr.msk.f32.vlgmr.msra.gmra.mxu0 %vm1391_vm10, %v1704_v10  ;;  %v2815_v10 = vld [vmem:[%s4855_s7 + $0x50] sm:$0xff] }
 0x16c   : > { %3412 = vmatprep.subr.mxu0 %v3699_v2  ;;  %3446 = vmatpush3.msra.mxu1 %v2780_v16 }
 0x16d   : > { %3413 = vmatpush3.msra.mxu0 %v2770_v17  ;;  %3447 = vmatprep.subr.mxu1 %v3699_v2 }
 0x16e   : > { %3414 = vmatprep.subr.mxu0 %v3699_v2  ;;  %3448 = vmatpush3.msra.mxu1 %v2779_v18 }
 0x16f   : > { %3415 = vmatpush3.msra.mxu0 %v2769_v19  ;;  %3449 = vmatprep.subr.mxu1 %v3699_v2 }
 0x170   : > { %3416 = vmatprep.subr.mxu0 %v3699_v2  ;;  %3450 = vmatpush3.msra.mxu1 %v2778_v20 }
 0x171   : > { %3417 = vmatpush3.msra.mxu0 %v2768_v21  ;;  %3451 = vmatprep.subr.mxu1 %v3699_v2 }
 0x172   : > { %3418 = vmatprep.subr.mxu0 %v3699_v2  ;;  %3452 = vmatpush3.msra.mxu1 %v2777_v22 }
 0x173   : > { %3419 = vmatpush3.msra.mxu0 %v2767_v23  ;;  %3453 = vmatprep.subr.mxu1 %v3699_v2 }
 0x174   : > { %3420 = vmatprep.subr.mxu0 %v3699_v2  ;;  %3454 = vmatpush3.msra.mxu1 %v2776_v24 }
 0x175   : > { %3421 = vmatpush3.msra.mxu0 %v2766_v25  ;;  %3455 = vmatprep.subr.mxu1 %v3699_v2 }
 0x176   : > { %3422 = vmatprep.subr.mxu0 %v3699_v2  ;;  %3456 = vmatpush3.msra.mxu1 %v2775_v26 }
 0x177   : > { %3423 = vmatpush3.msra.mxu0 %v2765_v27  ;;  %3457 = vmatprep.subr.mxu1 %v3699_v2 }
 0x178   : > { %3424 = vmatprep.subr.mxu0 %v3699_v2  ;;  %3458 = vmatpush3.msra.mxu1 %v2774_v28 }
 0x179   : > { %3425 = vmatpush3.msra.mxu0 %v2764_v31  ;;  %3459 = vmatprep.subr.mxu1 %v3699_v2 }
 0x17a   : > { %3426 = vmatprep.subr.mxu0 %v3699_v2  ;;  %3460 = vmatpush3.msra.mxu1 %v2773_v32 }
 0x17b   : > { %3427 = vmatpush3.msra.mxu0 %v2763_v33  ;;  %3461 = vmatprep.subr.mxu1 %v3699_v2 }
 0x17c   : > { %3428 = vmatprep.subr.mxu0 %v3699_v2  ;;  %3462 = vmatpush3.msra.mxu1 %v2772_v34 }
 0x17d   : > { %3463 = vmatprep.mubr.msk.f32.mxu1 %vm3700_vm3, %v3699_v2  ;;  %3429 = vmatpush3.msra.mxu0 %v2762_v35 }
 0x17e   : > { %3464 = vmatmul.mubr.msk.f32.vlgmr.msra.gmra.mxu1 %vm1391_vm10, %v4263_v29  ;;  %3493 = vmatprep.subr.mxu1 %v3699_v2 }
 0x17f   : > { %3430 = vmatprep.subr.mxu0 %v3699_v2  ;;  %3494 = vmatpush3.msra.mxu1 %v2809_v36 }
 0x180   : > { %3431 = vmatpush3.msra.mxu0 %v2761_v37  ;;  %3495 = vmatprep.subr.mxu1 %v3699_v2 }
 0x181   : > { %3432 = vmatprep.subr.mxu0 %v3699_v2  ;;  %3496 = vmatpush3.msra.mxu1 %v2808_v40 }
 0x182   : > { %3433 = vmatpush3.msra.mxu0 %v2760_v41  ;;  %3497 = vmatprep.subr.mxu1 %v3699_v2 }
 0x183   : > { %3434 = vmatprep.subr.mxu0 %v3699_v2  ;;  %3498 = vmatpush3.msra.mxu1 %v2807_v38  ;;  %v2811_v38 = vld [vmem:[%s4854_s6] ss:$0 sm:$0xff] }
 0x184   : > { %3435 = vmatpush3.msra.mxu0 %v2759_v39  ;;  %3436 = vmatprep.mubr.msk.f32.mxu0 %vm3700_vm3, %v3699_v2 }
 0x185   : > { %3499 = vmatprep.subr.mxu1 %v3699_v2  ;;  %3437 = vmatmul.mubr.msk.f32.vlgmr.msra.gmra.mxu0 %vm1391_vm10, %v4263_v29  ;;  %v2794_v29 = vld [vmem:[%s4852_s4 + $0x1c8] sm:$0xff] }
 0x186   : > { %3466 = vmatprep.subr.mxu0 %v3699_v2  ;;  %3500 = vmatpush3.msra.mxu1 %v2806_v44 }
 0x187   : > { %3467 = vmatpush3.msra.mxu0 %v2796_v45  ;;  %3501 = vmatprep.subr.mxu1 %v3699_v2 }
 0x188   : > { %3468 = vmatprep.subr.mxu0 %v3699_v2  ;;  %3502 = vmatpush3.msra.mxu1 %v2805_v46 }
 0x189   : > { %3469 = vmatpush3.msra.mxu0 %v2795_v47  ;;  %3503 = vmatprep.subr.mxu1 %v3699_v2 }
 0x18a   : > { %3470 = vmatprep.subr.mxu0 %v3699_v2  ;;  %3504 = vmatpush3.msra.mxu1 %v2804_v48 }
 0x18b   : > { %3471 = vmatpush3.msra.mxu0 %v2794_v29  ;;  %3505 = vmatprep.subr.mxu1 %v3699_v2 }
 0x18c   : > { %3472 = vmatprep.subr.mxu0 %v3699_v2  ;;  %3506 = vmatpush3.msra.mxu1 %v2803_v49 }
 0x18d   : > { %3473 = vmatpush3.msra.mxu0 %v2793_v50  ;;  %3507 = vmatprep.subr.mxu1 %v3699_v2 }
 0x18e   : > { %3474 = vmatprep.subr.mxu0 %v3699_v2  ;;  %3508 = vmatpush3.msra.mxu1 %v2802_v51 }
 0x18f   : > { %3475 = vmatpush3.msra.mxu0 %v2792_v52  ;;  %3509 = vmatprep.subr.mxu1 %v3699_v2 }
 0x190   : > { %3476 = vmatprep.subr.mxu0 %v3699_v2  ;;  %3510 = vmatpush3.msra.mxu1 %v2801_v53  ;;  %v2829_v53 = vld [vmem:[%s4855_s7 + $0xb8] sm:$0xff] }
 0x191   : > { %3477 = vmatpush3.msra.mxu0 %v2791_v56  ;;  %3511 = vmatprep.subr.mxu1 %v3699_v2 }
 0x192   : > { %3478 = vmatprep.subr.mxu0 %v3699_v2  ;;  %3512 = vmatpush3.msra.mxu1 %v2800_v57  ;;  %v2828_v57 = vld [vmem:[%s4855_s7 + $0xb0] sm:$0xff] }
 0x193   : > { %3479 = vmatpush3.msra.mxu0 %v2790_v54  ;;  %3513 = vmatprep.subr.mxu1 %v3699_v2  ;;  %v2838_v54 = vld [vmem:[%s4855_s7 + $0xf8] sm:$0xff] }
 0x194   : > { %3480 = vmatprep.subr.mxu0 %v3699_v2  ;;  %3514 = vmatpush3.msra.mxu1 %v2799_v55  ;;  %v2827_v55 = vld [vmem:[%s4855_s7 + $0xa8] sm:$0xff] }
 0x195   : > { %3481 = vmatpush3.msra.mxu0 %v2789_v58  ;;  %3515 = vmatprep.subr.mxu1 %v3699_v2  ;;  %v2837_v58 = vld [vmem:[%s4855_s7 + $0xf0] sm:$0xff] }
 0x196   : > { %3482 = vmatprep.subr.mxu0 %v3699_v2  ;;  %3516 = vmatpush3.msra.mxu1 %v2798_v59  ;;  %v2826_v59 = vld [vmem:[%s4855_s7 + $0xa0] sm:$0xff] }
 0x197   : > { %3517 = vmatprep.mubr.msk.f32.mxu1 %vm3700_vm3, %v3699_v2  ;;  %3483 = vmatpush3.msra.mxu0 %v2788_v60  ;;  %v2836_v60 = vld [vmem:[%s4855_s7 + $0xe8] sm:$0xff] }
 0x198   : > { %3518 = vmatmul.mubr.msk.f32.vlgmr.msra.gmra.mxu1 %vm1391_vm10, %v4266_v30  ;;  %3484 = vmatprep.subr.mxu0 %v3699_v2 }
 0x199   : > { %3485 = vmatpush3.msra.mxu0 %v2787_v61  ;;  %3490 = vmatprep.mubr.msk.f32.mxu0 %vm3700_vm3, %v3699_v2  ;;  %v2825_v61 = vld [vmem:[%s4855_s7 + $0x98] sm:$0xff] }
 0x19a   : > { %3486 = vmatprep.subr.mxu0 %v3699_v2  ;;  %3539 = vmatprep.subr.mxu1 %v3699_v2 }
 0x19b   : > { %3487 = vmatpush3.msra.mxu0 %v2786_v42  ;;  %3555 = vmatprep.mubr.msk.f32.mxu1 %vm3700_vm3, %v3699_v2  ;;  %v2835_v42 = vld [vmem:[%s4855_s7 + $0xe0] sm:$0xff] }
 0x19c   : > { %3488 = vmatprep.subr.mxu0 %v3699_v2 }
 0x19d   : > { %3489 = vmatpush3.msra.mxu0 %v2785_v43  ;;  %v2824_v43 = vld [vmem:[%s4855_s7 + $0x90] sm:$0xff] }
 0x19e   : > { %3491 = vmatmul.mubr.msk.f32.vlgmr.msra.gmra.mxu0 %vm1391_vm10, %v4266_v30  ;;  %3520 = vmatprep.subr.mxu0 %v3699_v2  ;;  %v2820_v30 = vld [vmem:[%s4855_s7 + $0x78] sm:$0xff] }
 0x19f   : > { %3536 = vmatprep.mubr.msk.f32.mxu0 %vm3700_vm3, %v3699_v2  ;;  %3521 = vmatpush3.msra.mxu0 %v2232_v62  ;;  %v2834_v62 = vld [vmem:[%s4855_s7 + $0xd8] sm:$0xff] }
 0x1a0   : > { %3522 = vmatprep.subr.mxu0 %v3699_v2  ;;  %3540 = vmatpush3.msra.mxu1 %v2820_v30  ;;  %v2833_v30 = vld [vmem:[%s4855_s7 + $0xd0] sm:$0xff] }
 0x1a1   : > { %3523 = vmatpush3.msra.mxu0 %v2231_v63  ;;  %3541 = vmatprep.subr.mxu1 %v3699_v2  ;;  %v2823_v63 = vld [vmem:[%s4855_s7 + $0x88] sm:$0xff] }
 0x1a2   : > { %3524 = vmatprep.subr.mxu0 %v3699_v2  ;;  %3542 = vmatpush3.msra.mxu1 %v2819_v1  ;;  %v2832_v1 = vld [vmem:[%s4855_s7 + $0xc8] sm:$0xff] }
 0x1a3   : > { %3525 = vmatpush3.msra.mxu0 %v2230_v0  ;;  %3543 = vmatprep.subr.mxu1 %v3699_v2  ;;  %v2822_v0 = vld [vmem:[%s4855_s7 + $0x80] sm:$0xff] }
 0x1a4   : > { %3526 = vmatprep.subr.mxu0 %v3699_v2  ;;  %3544 = vmatpush3.msra.mxu1 %v2818_v4  ;;  %v2831_v4 = vld [vmem:[%s4855_s7 + $0xc0] sm:$0xff] }
 0x1a5   : > { %3527 = vmatpush3.msra.mxu0 %v2229_v3  ;;  %3545 = vmatprep.subr.mxu1 %v3699_v2 }
 0x1a6   : > { %3528 = vmatprep.subr.mxu0 %v3699_v2  ;;  %3546 = vmatpush3.msra.mxu1 %v2817_v6 }
 0x1a7   : > { %3529 = vmatpush3.msra.mxu0 %v2228_v5  ;;  %3547 = vmatprep.subr.mxu1 %v3699_v2 }
 0x1a8   : > { %3530 = vmatprep.subr.mxu0 %v3699_v2  ;;  %3548 = vmatpush3.msra.mxu1 %v2816_v8 }
 0x1a9   : > { %3531 = vmatpush3.msra.mxu0 %v2227_v7  ;;  %3549 = vmatprep.subr.mxu1 %v3699_v2 }
 0x1aa   : > { %3532 = vmatprep.subr.mxu0 %v3699_v2  ;;  %3550 = vmatpush3.msra.mxu1 %v2815_v10  ;;  %v2220_v10 = vld [vmem:[%s4856_s8] sm:$0x1] }
 0x1ab   : > { %3533 = vmatpush3.msra.mxu0 %v2226_v9  ;;  %3551 = vmatprep.subr.mxu1 %v3699_v2 }
 0x1ac   : > { %3534 = vmatprep.subr.mxu0 %v3699_v2  ;;  %3552 = vmatpush3.msra.mxu1 %v2814_v12 }
 0x1ad   : > { %3535 = vmatpush3.msra.mxu0 %v2225_v11  ;;  %3553 = vmatprep.subr.mxu1 %v3699_v2 }
 0x1ae   : > { %3558 = vmatprep.subr.mxu0 %v3699_v2  ;;  %3554 = vmatpush3.msra.mxu1 %v2813_v13 }
 0x1af   : > { %3577 = vmatprep.subr.mxu1 %v3699_v2 }
 0x1f1   : > { %v1532_v14 = vpop.f32.mrf.mxu1 }
 0x1f3   : > { %v3303_v15 = vpop.f32.mrf.mxu1 }
 0x1f9   : > { %v1460_v16 = vpop.f32.mrf.mxu0 }
 0x1fa   : > { %v1533_v17 = vadd.f32 %v1532_v14, %v1460_v16 }
 0x1fb   : > { %v3276_v18 = vpop.f32.mrf.mxu0 }
 0x209   : > { %v1685_v19 = vpop.f32.mrf.mxu1 }
 0x20b   : > { %v3357_v20 = vpop.f32.mrf.mxu1 }
 0x211   : > { %v1615_v21 = vpop.f32.mrf.mxu0 }
 0x212   : > { %v1686_v22 = vadd.f32 %v1685_v19, %v1615_v21 }
 0x213   : > { %v3330_v23 = vpop.f32.mrf.mxu0 }
 0x224   : > { %v1857_v24 = vpop.f32.mrf.mxu1 }
 0x225   : > { %v1861_v34 = vadd.f32 %v1857_v24, %v1686_v22 }
 0x226   : > { %v3411_v25 = vpop.f32.mrf.mxu1 }
 0x22b   : > { %v1773_v26 = vpop.f32.mrf.mxu0 }
 0x22c   : > { %v1777_v40 = vadd.f32 %v1773_v26, %v1533_v17 }
 0x22d   : > { %v3384_v27 = vpop.f32.mrf.mxu0 }
 0x23e   : > { %v2030_v28 = vpop.f32.mrf.mxu1 }
 0x23f   : > { %v2034_v36 = vadd.f32 %v2030_v28, %v1861_v34 }
 0x240   : > { %v3465_v31 = vpop.f32.mrf.mxu1 }
 0x245   : > { %v1946_v32 = vpop.f32.mrf.mxu0 }
 0x246   : > { %v1950_v39 = vadd.f32 %v1946_v32, %v1777_v40 }
 0x247   : > { %v3438_v33 = vpop.f32.mrf.mxu0 }
 0x258   : > { %v2203_v35 = vpop.f32.mrf.mxu1 }
 0x259   : > { %v2207_v41 = vadd.f32 %v2203_v35, %v2034_v36 }
 0x25a   : > { %v3519_v37 = vpop.f32.mrf.mxu1 }
 0x25b   : > { %v2217_v45 = vadd.f32 %v2811_v38, %v2207_v41 }
 0x25d   : > { %v2218_v29 = vmax.f32 %v2217_v45, 0.0 }
 0x25e   : > { %v2119_v44 = vpop.f32.mrf.mxu0 }
 0x25f   : > { %v2123_v46 = vadd.f32 %v2119_v44, %v1950_v39 }
 0x260   : > { %v3492_v47 = vpop.f32.mrf.mxu0 }
 0x261   : > { %v2215_v48 = vadd.f32 %v2811_v38, %v2123_v46 }
 0x263   : > { %v2216_v49 = vmax.f32 %v2215_v48, 0.0 }
 0x265   : > { %v2219_v50 = vmax.f32 %v2216_v49, %v2218_v29 }
 0x267   : > { %v2222_v51 = vrot.slane %v2219_v50, 1 }
 0x269   : > { %v2224_v52 = vmax.f32 %v2219_v50, %v2222_v51 }
 0x26b   : > { %3537 = vmatmul.mubr.msk.f32.vlgmr.msra.gmra.mxu0 %vm2233_vm11, %v2224_v52  ;;  %v2317_v56 = vrot.slane %v2224_v52, 2  ;;  %v2400_v3 = vrot.slane %v2224_v52, 4  ;;  %v2483_v5 = vrot.slane %v2224_v52, 6 }
 0x26c   : > { %3559 = vmatpush3.msra.mxu0 %v2829_v53  ;;  %3574 = vmatprep.mubr.msk.f32.mxu0 %vm3700_vm3, %v3699_v2 }
 0x26d   : > { %3560 = vmatprep.subr.mxu0 %v3699_v2  ;;  %3556 = vmatmul.mubr.msk.f32.vlgmr.msra.gmra.mxu1 %vm2233_vm11, %v2317_v56 }
 0x26e   : > { %3561 = vmatpush3.msra.mxu0 %v2828_v57  ;;  %3578 = vmatpush3.msra.mxu1 %v2838_v54 }
 0x26f   : > { %3562 = vmatprep.subr.mxu0 %v3699_v2  ;;  %3579 = vmatprep.subr.mxu1 %v3699_v2 }
 0x270   : > { %3563 = vmatpush3.msra.mxu0 %v2827_v55  ;;  %3580 = vmatpush3.msra.mxu1 %v2837_v58 }
 0x271   : > { %3564 = vmatprep.subr.mxu0 %v3699_v2  ;;  %3581 = vmatprep.subr.mxu1 %v3699_v2 }
 0x272   : > { %3565 = vmatpush3.msra.mxu0 %v2826_v59  ;;  %3582 = vmatpush3.msra.mxu1 %v2836_v60 }
 0x273   : > { %3566 = vmatprep.subr.mxu0 %v3699_v2  ;;  %3583 = vmatprep.subr.mxu1 %v3699_v2 }
 0x274   : > { %3567 = vmatpush3.msra.mxu0 %v2825_v61  ;;  %3584 = vmatpush3.msra.mxu1 %v2835_v42 }
 0x275   : > { %3568 = vmatprep.subr.mxu0 %v3699_v2  ;;  %3585 = vmatprep.subr.mxu1 %v3699_v2 }
 0x276   : > { %3569 = vmatpush3.msra.mxu0 %v2824_v43  ;;  %3586 = vmatpush3.msra.mxu1 %v2834_v62 }
 0x277   : > { %3570 = vmatprep.subr.mxu0 %v3699_v2  ;;  %3587 = vmatprep.subr.mxu1 %v3699_v2 }
 0x278   : > { %3571 = vmatpush3.msra.mxu0 %v2823_v63  ;;  %3588 = vmatpush3.msra.mxu1 %v2833_v30 }
 0x279   : > { %3572 = vmatprep.subr.mxu0 %v3699_v2  ;;  %3589 = vmatprep.subr.mxu1 %v3699_v2 }
 0x27a   : > { %3573 = vmatpush3.msra.mxu0 %v2822_v0  ;;  %3590 = vmatpush3.msra.mxu1 %v2832_v1 }
 0x27b   : > { %3575 = vmatmul.mubr.msk.f32.vlgmr.msra.gmra.mxu0 %vm2233_vm11, %v2400_v3  ;;  %3591 = vmatprep.subr.mxu1 %v3699_v2 }
 0x27c   : > { %3592 = vmatpush3.msra.mxu1 %v2831_v4  ;;  %3593 = vmatprep.mubr.msk.f32.mxu1 %vm3700_vm3, %v3699_v2 }
 0x27d   : > { %3594 = vmatmul.mubr.msk.f32.vlgmr.msra.gmra.mxu1 %vm2233_vm11, %v2483_v5 }
 0x32b   : > { %v2303_v6 = vpop.f32.mrf.mxu0 }
 0x32c   : > { %v2307_v11 = vadd.f32 %v2303_v6, %v2220_v10 }
 0x32d   : > { %v3538_v7 = vpop.f32.mrf.mxu0  ;;  %v2386_v8 = vpop.f32.mrf.mxu1 }
 0x32e   : > { %v2390_v12 = vadd.f32 %v2386_v8, %v2307_v11 }
 0x32f   : > { %v3557_v9 = vpop.f32.mrf.mxu1 }
 0x33b   : > { %v2469_v13 = vpop.f32.mrf.mxu0 }
 0x33c   : > { %v2473_v14 = vadd.f32 %v2469_v13, %v2390_v12 }
 0x33d   : > { %v3576_v2 = vpop.f32.mrf.mxu0  ;;  %v2552_v15 = vpop.f32.mrf.mxu1 }
 0x33e   : > { %v2556_v16 = vadd.f32 %v2552_v15, %v2473_v14 }
 0x33f   : > { %v3595_v17 = vpop.f32.mrf.mxu1 }
 0x340   : > { %2557 = vst [vmem:[%s324_s22] sm:$0x1] %v2556_v16 }
 0x341   : > { %3650 = shalt.err (!%p3647_p3)
}
 0x342   : > { %s3651_s16 = scalar_lea.hbm %s4813_s26, 16  ;;  %s3655_s22 = scalar_lea.hbm %s4857_s9, 32 }
 0x343   : > { %p3652_p4 = scmp.ne.s32.totalorder %s4813_s26, %s3651_s16  ;;  %p3656_p9 = scmp.lt.s32.totalorder %s4813_s26, %s4857_s9 }
 0x344   : > { %p3657_p10 = scmp.lt.s32.totalorder %s3655_s22, %s3651_s16 }
 0x345   : > { %p3653_p7 = pnand %p3652_p4, %p3790_p5 }
 0x346   : > { %p3658_p11 = por %p3657_p10, %p3656_p9 }
 0x347   : > { %p3654_p8 = pneg %p3653_p7 }
 0x349   : > { %p3659_p12 = pnand %p3658_p11, %p3654_p8 }
 0x34b   : > { %3662 = shalt.err (!%p3659_p12)
}
 0x34c   : > { %3596 = dma.vmem_to_hbm [thread:$0]  (%p3790_p5), %s2572_s23, 16, %s4813_s26, %s2559_s27  }
 0x34d PF: > { %p3602_p13 = scmp.ge.s32.totalorder %s3697_s12, 2  ;;  %s2583_s28 = sand.u32 1, %s3685_s30  }
 0x34e   : > { %s2584_s13 = scalar_lea.sflag [#allocation4], %s2583_s28 }
 0x34f   : > { %p3599_p0 = pnand %p3602_p13, %p3794_p6 }
 0x351   : > { %p3600_p1 = pneg %p3599_p0 }
 0x353   : > { %3680 = dma.done.wait (%p3600_p1), %s2584_s13, 16  }
 0x354   : > { %3682 = vsyncadd (%p3600_p1), %s2584_s13, 4294967280  ;;  %p19_p2 = scmp.ge.s32.totalorder %s3777_s15, 4   ;;  %s4860_s30 = smov %s3689_s10 }
 0x355   : > { %s4861_s10 = smov %s3693_s11  ;;  %s4862_s11 = smov %s3788_s18 }
 0x356   : > { %s4863_s12 = smov %s3777_s15  ;;  %21 = sbr.rel (!%p19_p2) target bundleno = 3 (0x3), region = 110 }
 0x35b   :  { %2588 = vsyncpa [#allocation4], 1 }
 0x35c   :  { %2590 = vsyncpa [#allocation4 + $0x1], 1 }

</bundles_post_ra>
